<compile_context>
chip_gen: v6e
topology: v6e:2x2x1
jax: 0.10.0
libtpu: 0.0.40
codegen_flags: <defaults>
</compile_context>

<pallas_src>
import functools

import jax
import jax.numpy as jnp
from jax.experimental import pallas as pl
from jax.experimental.pallas import tpu as pltpu

# ----------------------------- config (small) -----------------------------
VOCAB = 100
MAX_POS = 64
TYPE_VOCAB = 2
HIDDEN = 32
HEADS = 2
HEAD_DIM = HIDDEN // HEADS
INTER = 64
LAYERS = 2
NCLASS = 3
LN_EPS = 1e-12  # BERT LayerNorm eps


# ------------------------- fused encoder kernel ----------------------------
def _hbert_kernel(
    x_ref, bias_ref, eg_ref, eb_ref,
    wqkv_ref, bqkv_ref, wo_ref, bo_ref, ln1g_ref, ln1b_ref,
    wi_ref, bi_ref, wo2_ref, bo2_ref, ln2g_ref, ln2b_ref,
    cw_ref, cb_ref, out_ref, *, batch, seq):
  D = HIDDEN
  Dh = HEAD_DIM
  scale = 1.0 / float(Dh) ** 0.5

  def layernorm(h, g, b):
    mu = jnp.mean(h, axis=-1, keepdims=True)
    xc = h - mu
    var = jnp.mean(xc * xc, axis=-1, keepdims=True)
    return xc * jax.lax.rsqrt(var + LN_EPS) * g + b

  def mm(a, w):  # bf16 MXU operands, f32 accumulation
    return jnp.dot(a.astype(jnp.bfloat16), w, preferred_element_type=jnp.float32)

  # Embedding LayerNorm (no zero residual streamed through the kernel).
  x = layernorm(x_ref[...], eg_ref[...], eb_ref[...])
  bias = bias_ref[...]  # (B, S) additive mask: 0 keep / -10000 padded keys

  for l in range(LAYERS):  # static unroll, L = 2
    # ---- fused QKV projection ----
    qkv = mm(x, wqkv_ref[l]) + bqkv_ref[l]                     # (T, 3D) f32

    # ---- self-attention: heads sliced from the lane axis, static unroll ----
    ctx_rows = []
    for b in range(batch):
      r0, r1 = b * seq, (b + 1) * seq
      bias_b = bias[b:b + 1, :]                                # (1, S)
      head_outs = []
      for h in range(HEADS):
        c0, c1 = h * Dh, (h + 1) * Dh
        qh = qkv[r0:r1, c0:c1].astype(jnp.bfloat16)            # (S, Dh)
        kh = qkv[r0:r1, D + c0:D + c1].astype(jnp.bfloat16)
        vh = qkv[r0:r1, 2 * D + c0:2 * D + c1].astype(jnp.bfloat16)
        s = jax.lax.dot_general(
            qh, kh, (((1,), (1,)), ((), ())),
            preferred_element_type=jnp.float32) * scale + bias_b   # (S, S)
        p = jnp.exp(s)  # masked logits (~-1e4) underflow to exactly 0.0
        p = p * pl.reciprocal(jnp.sum(p, axis=-1, keepdims=True), approx=True)
        head_outs.append(
            jnp.dot(p.astype(jnp.bfloat16), vh,
                    preferred_element_type=jnp.float32))           # (S, Dh)
      ctx_rows.append(jnp.concatenate(head_outs, axis=-1))         # (S, D)
    ctx = jnp.concatenate(ctx_rows, axis=0)                        # (T, D)

    attn_out = mm(ctx, wo_ref[l]) + bo_ref[l]
    x = layernorm(attn_out + x, ln1g_ref[l], ln1b_ref[l])

    inter = mm(x, wi_ref[l]) + bi_ref[l]
    # exact (erf) GELU, matching HF BERT's "gelu"
    inter = 0.5 * inter * (1.0 + jax.lax.erf(inter * 0.7071067811865475))
    ffn_out = mm(inter, wo2_ref[l]) + bo2_ref[l]
    x = layernorm(ffn_out + x, ln2g_ref[l], ln2b_ref[l])

  # torch.max(token_embeddings, dim=1)[0] (padded tokens included, as in HBert)
  pooled = jnp.concatenate(
      [jnp.max(x[b * seq:(b + 1) * seq, :], axis=0, keepdims=True)
       for b in range(batch)], axis=0)                             # (B, D)
  # TODO(synk): nn.Dropout(0.1) is identity at inference; the pooled "cls" output
  # (pooler.dense) is unused by HBert.forward and therefore not computed.
  out_ref[...] = mm(pooled, cw_ref[...]) + cb_ref[...]


# ------------------------------ parameters ---------------------------------
def init_params(key):
  def nrm(k, shape, std=0.02):
    return std * jax.random.normal(k, shape, dtype=jnp.float32)

  keys = jax.random.split(key, 4 + LAYERS)
  params = {
      "word_emb": nrm(keys[0], (VOCAB, HIDDEN)),
      "pos_emb": nrm(keys[1], (MAX_POS, HIDDEN)),
      "type_emb": nrm(keys[2], (TYPE_VOCAB, HIDDEN)),
      "emb_ln_g": jnp.ones((HIDDEN,), jnp.float32),
      "emb_ln_b": jnp.zeros((HIDDEN,), jnp.float32),
      "layers": [],
  }
  for l in range(LAYERS):
    k = jax.random.split(keys[3 + l], 6)
    params["layers"].append(
        dict(
            wq=nrm(k[0], (HIDDEN, HIDDEN)), bq=jnp.zeros((HIDDEN,), jnp.float32),
            wk=nrm(k[1], (HIDDEN, HIDDEN)), bk=jnp.zeros((HIDDEN,), jnp.float32),
            wv=nrm(k[2], (HIDDEN, HIDDEN)), bv=jnp.zeros((HIDDEN,), jnp.float32),
            wo=nrm(k[3], (HIDDEN, HIDDEN)), bo=jnp.zeros((HIDDEN,), jnp.float32),
            ln1_g=jnp.ones((HIDDEN,), jnp.float32),
            ln1_b=jnp.zeros((HIDDEN,), jnp.float32),
            wi=nrm(k[4], (HIDDEN, INTER)), bi=jnp.zeros((INTER,), jnp.float32),
            wo2=nrm(k[5], (INTER, HIDDEN)), bo2=jnp.zeros((HIDDEN,), jnp.float32),
            ln2_g=jnp.ones((HIDDEN,), jnp.float32),
            ln2_b=jnp.zeros((HIDDEN,), jnp.float32),
        )
    )
  kc = jax.random.split(keys[3 + LAYERS], 2)
  params["clf_w"] = nrm(kc[0], (HIDDEN, NCLASS))
  params["clf_b"] = jnp.zeros((NCLASS,), jnp.float32)
  return params


def pack_params(params):
  """Stack per-layer weights; matmul operands in bf16, biases/LN params in f32."""
  ls = params["layers"]

  def stk(fn):
    return jnp.stack([fn(lp) for lp in ls], axis=0)

  return dict(
      emb_ln_g=params["emb_ln_g"].reshape(1, HIDDEN),
      emb_ln_b=params["emb_ln_b"].reshape(1, HIDDEN),
      wqkv=stk(lambda lp: jnp.concatenate([lp["wq"], lp["wk"], lp["wv"]], axis=1)
               ).astype(jnp.bfloat16),                       # (L, D, 3D)
      bqkv=stk(lambda lp: jnp.concatenate([lp["bq"], lp["bk"], lp["bv"]])
               )[:, None, :],                                # (L, 1, 3D)
      wo=stk(lambda lp: lp["wo"]).astype(jnp.bfloat16),      # (L, D, D)
      bo=stk(lambda lp: lp["bo"])[:, None, :],
      ln1_g=stk(lambda lp: lp["ln1_g"])[:, None, :],
      ln1_b=stk(lambda lp: lp["ln1_b"])[:, None, :],
      wi=stk(lambda lp: lp["wi"]).astype(jnp.bfloat16),      # (L, D, INTER)
      bi=stk(lambda lp: lp["bi"])[:, None, :],
      wo2=stk(lambda lp: lp["wo2"]).astype(jnp.bfloat16),    # (L, INTER, D)
      bo2=stk(lambda lp: lp["bo2"])[:, None, :],
      ln2_g=stk(lambda lp: lp["ln2_g"])[:, None, :],
      ln2_b=stk(lambda lp: lp["ln2_b"])[:, None, :],
      clf_w=params["clf_w"].astype(jnp.bfloat16),            # (D, NCLASS)
      clf_b=params["clf_b"].reshape(1, NCLASS),
  )


# ------------------------------- forward -----------------------------------
def hbert_forward(params, packed, input_ids, attention_mask):
  B, S = input_ids.shape

  # BERT embeddings (table gathers are XLA glue; everything else is one kernel).
  tok = jnp.take(params["word_emb"], input_ids, axis=0)          # (B, S, D)
  pos = params["pos_emb"][:S][None, :, :]
  typ = params["type_emb"][0][None, None, :]                     # token_type_ids = 0
  x_emb = (tok + pos + typ).reshape(B * S, HIDDEN)
  mask_bias = (1.0 - attention_mask.astype(jnp.float32)) * -10000.0   # (B, S)

  kernel = functools.partial(_hbert_kernel, batch=B, seq=S)
  vmem = pl.BlockSpec(memory_space=pltpu.MemorySpace.VMEM)
  return pl.pallas_call(
      kernel,
      out_shape=jax.ShapeDtypeStruct((B, NCLASS), jnp.float32),
      in_specs=[vmem] * 18,
      out_specs=vmem,
  )(x_emb, mask_bias, packed["emb_ln_g"], packed["emb_ln_b"],
    packed["wqkv"], packed["bqkv"], packed["wo"], packed["bo"],
    packed["ln1_g"], packed["ln1_b"], packed["wi"], packed["bi"],
    packed["wo2"], packed["bo2"], packed["ln2_g"], packed["ln2_b"],
    packed["clf_w"], packed["clf_b"])


# --------------------------------- main -------------------------------------
if __name__ == "__main__":
  B, S = 2, 8
  key = jax.random.PRNGKey(0)
  k_param, k_ids = jax.random.split(key)
  params = init_params(k_param)
  packed = pack_params(params)

  input_ids = jax.random.randint(k_ids, (B, S), 0, VOCAB, dtype=jnp.int32)
  attention_mask = jnp.array(
      [[1, 1, 1, 1, 1, 1, 1, 1],
       [1, 1, 1, 1, 1, 1, 0, 0]], dtype=jnp.int32)

  fwd = jax.jit(hbert_forward)
  out = jax.block_until_ready(fwd(params, packed, input_ids, attention_mask))
  assert out.shape == (B, NCLASS) and out.dtype == jnp.float32
  print("KERNEL_OK")
</pallas_src>

<mosaic_0001>
module attributes {stable_mosaic.version = 11 : i64} {
  func.func @_hbert_kernel(%arg0: memref<16x32xf32, #tpu.memory_space<vmem>>, %arg1: memref<2x8xf32, #tpu.memory_space<vmem>>, %arg2: memref<1x32xf32, #tpu.memory_space<vmem>>, %arg3: memref<1x32xf32, #tpu.memory_space<vmem>>, %arg4: memref<2x32x96xbf16, #tpu.memory_space<vmem>>, %arg5: memref<2x1x96xf32, #tpu.memory_space<vmem>>, %arg6: memref<2x32x32xbf16, #tpu.memory_space<vmem>>, %arg7: memref<2x1x32xf32, #tpu.memory_space<vmem>>, %arg8: memref<2x1x32xf32, #tpu.memory_space<vmem>>, %arg9: memref<2x1x32xf32, #tpu.memory_space<vmem>>, %arg10: memref<2x32x64xbf16, #tpu.memory_space<vmem>>, %arg11: memref<2x1x64xf32, #tpu.memory_space<vmem>>, %arg12: memref<2x64x32xbf16, #tpu.memory_space<vmem>>, %arg13: memref<2x1x32xf32, #tpu.memory_space<vmem>>, %arg14: memref<2x1x32xf32, #tpu.memory_space<vmem>>, %arg15: memref<2x1x32xf32, #tpu.memory_space<vmem>>, %arg16: memref<32x3xbf16, #tpu.memory_space<vmem>>, %arg17: memref<1x3xf32, #tpu.memory_space<vmem>>, %arg18: memref<2x3xf32, #tpu.memory_space<vmem>>) attributes {dimension_semantics = [], scalar_prefetch = 0 : i64, scratch_operands = 0 : i64, tpu.core_type = #tpu.core_type<tc>} {
    %c0 = arith.constant 0 : index
    %c0_0 = arith.constant 0 : index
    %0 = vector.load %arg0[%c0, %c0_0] : memref<16x32xf32, #tpu.memory_space<vmem>>, vector<16x32xf32>
    %c0_1 = arith.constant 0 : index
    %c0_2 = arith.constant 0 : index
    %1 = vector.load %arg2[%c0_1, %c0_2] : memref<1x32xf32, #tpu.memory_space<vmem>>, vector<1x32xf32>
    %c0_3 = arith.constant 0 : index
    %c0_4 = arith.constant 0 : index
    %2 = vector.load %arg3[%c0_3, %c0_4] : memref<1x32xf32, #tpu.memory_space<vmem>>, vector<1x32xf32>
    %cst = arith.constant dense<0.000000e+00> : vector<16xf32>
    %3 = vector.multi_reduction <add>, %0, %cst [1] : vector<16x32xf32> to vector<16xf32>
    %4 = vector.shape_cast %3 : vector<16xf32> to vector<16x1xf32>
    %cst_5 = arith.constant 3.200000e+01 : f32
    %5 = vector.broadcast %cst_5 : f32 to vector<16x1xf32>
    %6 = arith.divf %4, %5 : vector<16x1xf32>
    %7 = vector.broadcast %6 : vector<16x1xf32> to vector<16x32xf32>
    %8 = arith.subf %0, %7 : vector<16x32xf32>
    %9 = arith.mulf %8, %8 : vector<16x32xf32>
    %cst_6 = arith.constant dense<0.000000e+00> : vector<16xf32>
    %10 = vector.multi_reduction <add>, %9, %cst_6 [1] : vector<16x32xf32> to vector<16xf32>
    %11 = vector.shape_cast %10 : vector<16xf32> to vector<16x1xf32>
    %cst_7 = arith.constant 3.200000e+01 : f32
    %12 = vector.broadcast %cst_7 : f32 to vector<16x1xf32>
    %13 = arith.divf %11, %12 : vector<16x1xf32>
    %cst_8 = arith.constant 9.99999996E-13 : f32
    %14 = vector.broadcast %cst_8 : f32 to vector<16x1xf32>
    %15 = arith.addf %13, %14 : vector<16x1xf32>
    %16 = math.rsqrt %15 : vector<16x1xf32>
    %17 = vector.broadcast %16 : vector<16x1xf32> to vector<16x32xf32>
    %18 = arith.mulf %8, %17 : vector<16x32xf32>
    %19 = vector.broadcast %1 : vector<1x32xf32> to vector<16x32xf32>
    %20 = arith.mulf %18, %19 : vector<16x32xf32>
    %21 = vector.broadcast %2 : vector<1x32xf32> to vector<16x32xf32>
    %22 = arith.addf %20, %21 : vector<16x32xf32>
    %c0_9 = arith.constant 0 : index
    %c0_10 = arith.constant 0 : index
    %23 = vector.load %arg1[%c0_9, %c0_10] : memref<2x8xf32, #tpu.memory_space<vmem>>, vector<2x8xf32>
    %c0_11 = arith.constant 0 : index
    %c0_12 = arith.constant 0 : index
    %c0_13 = arith.constant 0 : index
    %24 = vector.load %arg4[%c0_11, %c0_12, %c0_13] : memref<2x32x96xbf16, #tpu.memory_space<vmem>>, vector<1x32x96xbf16>
    %25 = vector.shape_cast %24 : vector<1x32x96xbf16> to vector<32x96xbf16>
    %26 = arith.truncf %22 : vector<16x32xf32> to vector<16x32xbf16>
    %cst_14 = arith.constant dense<0.000000e+00> : vector<16x96xf32>
    %27 = tpu.matmul %26, %25, %cst_14 {dimension_numbers = #tpu.dot_dimension_numbers<[1], [0], [0], [1], [0, 0, 1, 1], [], []>} : vector<16x32xbf16>, vector<32x96xbf16>, vector<16x96xf32> -> vector<16x96xf32>
    %c0_15 = arith.constant 0 : index
    %c0_16 = arith.constant 0 : index
    %c0_17 = arith.constant 0 : index
    %28 = vector.load %arg5[%c0_15, %c0_16, %c0_17] : memref<2x1x96xf32, #tpu.memory_space<vmem>>, vector<1x1x96xf32>
    %29 = vector.shape_cast %28 : vector<1x1x96xf32> to vector<1x96xf32>
    %30 = vector.broadcast %29 : vector<1x96xf32> to vector<16x96xf32>
    %31 = arith.addf %27, %30 : vector<16x96xf32>
    %32 = vector.extract_strided_slice %23 {offsets = [0, 0], sizes = [1, 8], strides = [1, 1]} : vector<2x8xf32> to vector<1x8xf32>
    %33 = vector.extract_strided_slice %31 {offsets = [0, 0], sizes = [8, 16], strides = [1, 1]} : vector<16x96xf32> to vector<8x16xf32>
    %34 = arith.truncf %33 : vector<8x16xf32> to vector<8x16xbf16>
    %35 = vector.extract_strided_slice %31 {offsets = [0, 32], sizes = [8, 16], strides = [1, 1]} : vector<16x96xf32> to vector<8x16xf32>
    %36 = arith.truncf %35 : vector<8x16xf32> to vector<8x16xbf16>
    %37 = vector.extract_strided_slice %31 {offsets = [0, 64], sizes = [8, 16], strides = [1, 1]} : vector<16x96xf32> to vector<8x16xf32>
    %38 = arith.truncf %37 : vector<8x16xf32> to vector<8x16xbf16>
    %cst_18 = arith.constant dense<0.000000e+00> : vector<8x8xf32>
    %39 = tpu.matmul %34, %36, %cst_18 {dimension_numbers = #tpu.dot_dimension_numbers<[1], [1], [0], [0], [0, 0, 1, 0], [], []>} : vector<8x16xbf16>, vector<8x16xbf16>, vector<8x8xf32> -> vector<8x8xf32>
    %cst_19 = arith.constant 2.500000e-01 : f32
    %40 = vector.broadcast %cst_19 : f32 to vector<8x8xf32>
    %41 = arith.mulf %39, %40 : vector<8x8xf32>
    %42 = vector.broadcast %32 : vector<1x8xf32> to vector<8x8xf32>
    %43 = arith.addf %41, %42 : vector<8x8xf32>
    %44 = math.exp %43 : vector<8x8xf32>
    %cst_20 = arith.constant dense<0.000000e+00> : vector<8xf32>
    %45 = vector.multi_reduction <add>, %44, %cst_20 [1] : vector<8x8xf32> to vector<8xf32>
    %46 = vector.shape_cast %45 : vector<8xf32> to vector<8x1xf32>
    %47 = tpu.reciprocal %46 {approx = true} : vector<8x1xf32> -> vector<8x1xf32>
    %48 = vector.broadcast %47 : vector<8x1xf32> to vector<8x8xf32>
    %49 = arith.mulf %44, %48 : vector<8x8xf32>
    %50 = arith.truncf %49 : vector<8x8xf32> to vector<8x8xbf16>
    %cst_21 = arith.constant dense<0.000000e+00> : vector<8x16xf32>
    %51 = tpu.matmul %50, %38, %cst_21 {dimension_numbers = #tpu.dot_dimension_numbers<[1], [0], [0], [1], [0, 0, 1, 1], [], []>} : vector<8x8xbf16>, vector<8x16xbf16>, vector<8x16xf32> -> vector<8x16xf32>
    %52 = vector.extract_strided_slice %31 {offsets = [0, 16], sizes = [8, 16], strides = [1, 1]} : vector<16x96xf32> to vector<8x16xf32>
    %53 = arith.truncf %52 : vector<8x16xf32> to vector<8x16xbf16>
    %54 = vector.extract_strided_slice %31 {offsets = [0, 48], sizes = [8, 16], strides = [1, 1]} : vector<16x96xf32> to vector<8x16xf32>
    %55 = arith.truncf %54 : vector<8x16xf32> to vector<8x16xbf16>
    %56 = vector.extract_strided_slice %31 {offsets = [0, 80], sizes = [8, 16], strides = [1, 1]} : vector<16x96xf32> to vector<8x16xf32>
    %57 = arith.truncf %56 : vector<8x16xf32> to vector<8x16xbf16>
    %cst_22 = arith.constant dense<0.000000e+00> : vector<8x8xf32>
    %58 = tpu.matmul %53, %55, %cst_22 {dimension_numbers = #tpu.dot_dimension_numbers<[1], [1], [0], [0], [0, 0, 1, 0], [], []>} : vector<8x16xbf16>, vector<8x16xbf16>, vector<8x8xf32> -> vector<8x8xf32>
    %cst_23 = arith.constant 2.500000e-01 : f32
    %59 = vector.broadcast %cst_23 : f32 to vector<8x8xf32>
    %60 = arith.mulf %58, %59 : vector<8x8xf32>
    %61 = vector.broadcast %32 : vector<1x8xf32> to vector<8x8xf32>
    %62 = arith.addf %60, %61 : vector<8x8xf32>
    %63 = math.exp %62 : vector<8x8xf32>
    %cst_24 = arith.constant dense<0.000000e+00> : vector<8xf32>
    %64 = vector.multi_reduction <add>, %63, %cst_24 [1] : vector<8x8xf32> to vector<8xf32>
    %65 = vector.shape_cast %64 : vector<8xf32> to vector<8x1xf32>
    %66 = tpu.reciprocal %65 {approx = true} : vector<8x1xf32> -> vector<8x1xf32>
    %67 = vector.broadcast %66 : vector<8x1xf32> to vector<8x8xf32>
    %68 = arith.mulf %63, %67 : vector<8x8xf32>
    %69 = arith.truncf %68 : vector<8x8xf32> to vector<8x8xbf16>
    %cst_25 = arith.constant dense<0.000000e+00> : vector<8x16xf32>
    %70 = tpu.matmul %69, %57, %cst_25 {dimension_numbers = #tpu.dot_dimension_numbers<[1], [0], [0], [1], [0, 0, 1, 1], [], []>} : vector<8x8xbf16>, vector<8x16xbf16>, vector<8x16xf32> -> vector<8x16xf32>
    %71 = tpu.concatenate %51, %70 in 1 : vector<8x16xf32>, vector<8x16xf32> -> vector<8x32xf32>
    %72 = vector.extract_strided_slice %23 {offsets = [1, 0], sizes = [1, 8], strides = [1, 1]} : vector<2x8xf32> to vector<1x8xf32>
    %73 = vector.extract_strided_slice %31 {offsets = [8, 0], sizes = [8, 16], strides = [1, 1]} : vector<16x96xf32> to vector<8x16xf32>
    %74 = arith.truncf %73 : vector<8x16xf32> to vector<8x16xbf16>
    %75 = vector.extract_strided_slice %31 {offsets = [8, 32], sizes = [8, 16], strides = [1, 1]} : vector<16x96xf32> to vector<8x16xf32>
    %76 = arith.truncf %75 : vector<8x16xf32> to vector<8x16xbf16>
    %77 = vector.extract_strided_slice %31 {offsets = [8, 64], sizes = [8, 16], strides = [1, 1]} : vector<16x96xf32> to vector<8x16xf32>
    %78 = arith.truncf %77 : vector<8x16xf32> to vector<8x16xbf16>
    %cst_26 = arith.constant dense<0.000000e+00> : vector<8x8xf32>
    %79 = tpu.matmul %74, %76, %cst_26 {dimension_numbers = #tpu.dot_dimension_numbers<[1], [1], [0], [0], [0, 0, 1, 0], [], []>} : vector<8x16xbf16>, vector<8x16xbf16>, vector<8x8xf32> -> vector<8x8xf32>
    %cst_27 = arith.constant 2.500000e-01 : f32
    %80 = vector.broadcast %cst_27 : f32 to vector<8x8xf32>
    %81 = arith.mulf %79, %80 : vector<8x8xf32>
    %82 = vector.broadcast %72 : vector<1x8xf32> to vector<8x8xf32>
    %83 = arith.addf %81, %82 : vector<8x8xf32>
    %84 = math.exp %83 : vector<8x8xf32>
    %cst_28 = arith.constant dense<0.000000e+00> : vector<8xf32>
    %85 = vector.multi_reduction <add>, %84, %cst_28 [1] : vector<8x8xf32> to vector<8xf32>
    %86 = vector.shape_cast %85 : vector<8xf32> to vector<8x1xf32>
    %87 = tpu.reciprocal %86 {approx = true} : vector<8x1xf32> -> vector<8x1xf32>
    %88 = vector.broadcast %87 : vector<8x1xf32> to vector<8x8xf32>
    %89 = arith.mulf %84, %88 : vector<8x8xf32>
    %90 = arith.truncf %89 : vector<8x8xf32> to vector<8x8xbf16>
    %cst_29 = arith.constant dense<0.000000e+00> : vector<8x16xf32>
    %91 = tpu.matmul %90, %78, %cst_29 {dimension_numbers = #tpu.dot_dimension_numbers<[1], [0], [0], [1], [0, 0, 1, 1], [], []>} : vector<8x8xbf16>, vector<8x16xbf16>, vector<8x16xf32> -> vector<8x16xf32>
    %92 = vector.extract_strided_slice %31 {offsets = [8, 16], sizes = [8, 16], strides = [1, 1]} : vector<16x96xf32> to vector<8x16xf32>
    %93 = arith.truncf %92 : vector<8x16xf32> to vector<8x16xbf16>
    %94 = vector.extract_strided_slice %31 {offsets = [8, 48], sizes = [8, 16], strides = [1, 1]} : vector<16x96xf32> to vector<8x16xf32>
    %95 = arith.truncf %94 : vector<8x16xf32> to vector<8x16xbf16>
    %96 = vector.extract_strided_slice %31 {offsets = [8, 80], sizes = [8, 16], strides = [1, 1]} : vector<16x96xf32> to vector<8x16xf32>
    %97 = arith.truncf %96 : vector<8x16xf32> to vector<8x16xbf16>
    %cst_30 = arith.constant dense<0.000000e+00> : vector<8x8xf32>
    %98 = tpu.matmul %93, %95, %cst_30 {dimension_numbers = #tpu.dot_dimension_numbers<[1], [1], [0], [0], [0, 0, 1, 0], [], []>} : vector<8x16xbf16>, vector<8x16xbf16>, vector<8x8xf32> -> vector<8x8xf32>
    %cst_31 = arith.constant 2.500000e-01 : f32
    %99 = vector.broadcast %cst_31 : f32 to vector<8x8xf32>
    %100 = arith.mulf %98, %99 : vector<8x8xf32>
    %101 = vector.broadcast %72 : vector<1x8xf32> to vector<8x8xf32>
    %102 = arith.addf %100, %101 : vector<8x8xf32>
    %103 = math.exp %102 : vector<8x8xf32>
    %cst_32 = arith.constant dense<0.000000e+00> : vector<8xf32>
    %104 = vector.multi_reduction <add>, %103, %cst_32 [1] : vector<8x8xf32> to vector<8xf32>
    %105 = vector.shape_cast %104 : vector<8xf32> to vector<8x1xf32>
    %106 = tpu.reciprocal %105 {approx = true} : vector<8x1xf32> -> vector<8x1xf32>
    %107 = vector.broadcast %106 : vector<8x1xf32> to vector<8x8xf32>
    %108 = arith.mulf %103, %107 : vector<8x8xf32>
    %109 = arith.truncf %108 : vector<8x8xf32> to vector<8x8xbf16>
    %cst_33 = arith.constant dense<0.000000e+00> : vector<8x16xf32>
    %110 = tpu.matmul %109, %97, %cst_33 {dimension_numbers = #tpu.dot_dimension_numbers<[1], [0], [0], [1], [0, 0, 1, 1], [], []>} : vector<8x8xbf16>, vector<8x16xbf16>, vector<8x16xf32> -> vector<8x16xf32>
    %111 = tpu.concatenate %91, %110 in 1 : vector<8x16xf32>, vector<8x16xf32> -> vector<8x32xf32>
    %112 = tpu.concatenate %71, %111 in 0 : vector<8x32xf32>, vector<8x32xf32> -> vector<16x32xf32>
    %c0_34 = arith.constant 0 : index
    %c0_35 = arith.constant 0 : index
    %c0_36 = arith.constant 0 : index
    %113 = vector.load %arg6[%c0_34, %c0_35, %c0_36] : memref<2x32x32xbf16, #tpu.memory_space<vmem>>, vector<1x32x32xbf16>
    %114 = vector.shape_cast %113 : vector<1x32x32xbf16> to vector<32x32xbf16>
    %115 = arith.truncf %112 : vector<16x32xf32> to vector<16x32xbf16>
    %cst_37 = arith.constant dense<0.000000e+00> : vector<16x32xf32>
    %116 = tpu.matmul %115, %114, %cst_37 {dimension_numbers = #tpu.dot_dimension_numbers<[1], [0], [0], [1], [0, 0, 1, 1], [], []>} : vector<16x32xbf16>, vector<32x32xbf16>, vector<16x32xf32> -> vector<16x32xf32>
    %c0_38 = arith.constant 0 : index
    %c0_39 = arith.constant 0 : index
    %c0_40 = arith.constant 0 : index
    %117 = vector.load %arg7[%c0_38, %c0_39, %c0_40] : memref<2x1x32xf32, #tpu.memory_space<vmem>>, vector<1x1x32xf32>
    %118 = vector.shape_cast %117 : vector<1x1x32xf32> to vector<1x32xf32>
    %119 = vector.broadcast %118 : vector<1x32xf32> to vector<16x32xf32>
    %120 = arith.addf %116, %119 : vector<16x32xf32>
    %121 = arith.addf %120, %22 : vector<16x32xf32>
    %c0_41 = arith.constant 0 : index
    %c0_42 = arith.constant 0 : index
    %c0_43 = arith.constant 0 : index
    %122 = vector.load %arg8[%c0_41, %c0_42, %c0_43] : memref<2x1x32xf32, #tpu.memory_space<vmem>>, vector<1x1x32xf32>
    %123 = vector.shape_cast %122 : vector<1x1x32xf32> to vector<1x32xf32>
    %c0_44 = arith.constant 0 : index
    %c0_45 = arith.constant 0 : index
    %c0_46 = arith.constant 0 : index
    %124 = vector.load %arg9[%c0_44, %c0_45, %c0_46] : memref<2x1x32xf32, #tpu.memory_space<vmem>>, vector<1x1x32xf32>
    %125 = vector.shape_cast %124 : vector<1x1x32xf32> to vector<1x32xf32>
    %cst_47 = arith.constant dense<0.000000e+00> : vector<16xf32>
    %126 = vector.multi_reduction <add>, %121, %cst_47 [1] : vector<16x32xf32> to vector<16xf32>
    %127 = vector.shape_cast %126 : vector<16xf32> to vector<16x1xf32>
    %cst_48 = arith.constant 3.200000e+01 : f32
    %128 = vector.broadcast %cst_48 : f32 to vector<16x1xf32>
    %129 = arith.divf %127, %128 : vector<16x1xf32>
    %130 = vector.broadcast %129 : vector<16x1xf32> to vector<16x32xf32>
    %131 = arith.subf %121, %130 : vector<16x32xf32>
    %132 = arith.mulf %131, %131 : vector<16x32xf32>
    %cst_49 = arith.constant dense<0.000000e+00> : vector<16xf32>
    %133 = vector.multi_reduction <add>, %132, %cst_49 [1] : vector<16x32xf32> to vector<16xf32>
    %134 = vector.shape_cast %133 : vector<16xf32> to vector<16x1xf32>
    %cst_50 = arith.constant 3.200000e+01 : f32
    %135 = vector.broadcast %cst_50 : f32 to vector<16x1xf32>
    %136 = arith.divf %134, %135 : vector<16x1xf32>
    %cst_51 = arith.constant 9.99999996E-13 : f32
    %137 = vector.broadcast %cst_51 : f32 to vector<16x1xf32>
    %138 = arith.addf %136, %137 : vector<16x1xf32>
    %139 = math.rsqrt %138 : vector<16x1xf32>
    %140 = vector.broadcast %139 : vector<16x1xf32> to vector<16x32xf32>
    %141 = arith.mulf %131, %140 : vector<16x32xf32>
    %142 = vector.broadcast %123 : vector<1x32xf32> to vector<16x32xf32>
    %143 = arith.mulf %141, %142 : vector<16x32xf32>
    %144 = vector.broadcast %125 : vector<1x32xf32> to vector<16x32xf32>
    %145 = arith.addf %143, %144 : vector<16x32xf32>
    %c0_52 = arith.constant 0 : index
    %c0_53 = arith.constant 0 : index
    %c0_54 = arith.constant 0 : index
    %146 = vector.load %arg10[%c0_52, %c0_53, %c0_54] : memref<2x32x64xbf16, #tpu.memory_space<vmem>>, vector<1x32x64xbf16>
    %147 = vector.shape_cast %146 : vector<1x32x64xbf16> to vector<32x64xbf16>
    %148 = arith.truncf %145 : vector<16x32xf32> to vector<16x32xbf16>
    %cst_55 = arith.constant dense<0.000000e+00> : vector<16x64xf32>
    %149 = tpu.matmul %148, %147, %cst_55 {dimension_numbers = #tpu.dot_dimension_numbers<[1], [0], [0], [1], [0, 0, 1, 1], [], []>} : vector<16x32xbf16>, vector<32x64xbf16>, vector<16x64xf32> -> vector<16x64xf32>
    %c0_56 = arith.constant 0 : index
    %c0_57 = arith.constant 0 : index
    %c0_58 = arith.constant 0 : index
    %150 = vector.load %arg11[%c0_56, %c0_57, %c0_58] : memref<2x1x64xf32, #tpu.memory_space<vmem>>, vector<1x1x64xf32>
    %151 = vector.shape_cast %150 : vector<1x1x64xf32> to vector<1x64xf32>
    %152 = vector.broadcast %151 : vector<1x64xf32> to vector<16x64xf32>
    %153 = arith.addf %149, %152 : vector<16x64xf32>
    %cst_59 = arith.constant 5.000000e-01 : f32
    %154 = vector.broadcast %cst_59 : f32 to vector<16x64xf32>
    %155 = arith.mulf %154, %153 : vector<16x64xf32>
    %cst_60 = arith.constant 0.707106769 : f32
    %156 = vector.broadcast %cst_60 : f32 to vector<16x64xf32>
    %157 = arith.mulf %153, %156 : vector<16x64xf32>
    %158 = math.erf %157 : vector<16x64xf32>
    %cst_61 = arith.constant 1.000000e+00 : f32
    %159 = vector.broadcast %cst_61 : f32 to vector<16x64xf32>
    %160 = arith.addf %159, %158 : vector<16x64xf32>
    %161 = arith.mulf %155, %160 : vector<16x64xf32>
    %c0_62 = arith.constant 0 : index
    %c0_63 = arith.constant 0 : index
    %c0_64 = arith.constant 0 : index
    %162 = vector.load %arg12[%c0_62, %c0_63, %c0_64] : memref<2x64x32xbf16, #tpu.memory_space<vmem>>, vector<1x64x32xbf16>
    %163 = vector.shape_cast %162 : vector<1x64x32xbf16> to vector<64x32xbf16>
    %164 = arith.truncf %161 : vector<16x64xf32> to vector<16x64xbf16>
    %cst_65 = arith.constant dense<0.000000e+00> : vector<16x32xf32>
    %165 = tpu.matmul %164, %163, %cst_65 {dimension_numbers = #tpu.dot_dimension_numbers<[1], [0], [0], [1], [0, 0, 1, 1], [], []>} : vector<16x64xbf16>, vector<64x32xbf16>, vector<16x32xf32> -> vector<16x32xf32>
    %c0_66 = arith.constant 0 : index
    %c0_67 = arith.constant 0 : index
    %c0_68 = arith.constant 0 : index
    %166 = vector.load %arg13[%c0_66, %c0_67, %c0_68] : memref<2x1x32xf32, #tpu.memory_space<vmem>>, vector<1x1x32xf32>
    %167 = vector.shape_cast %166 : vector<1x1x32xf32> to vector<1x32xf32>
    %168 = vector.broadcast %167 : vector<1x32xf32> to vector<16x32xf32>
    %169 = arith.addf %165, %168 : vector<16x32xf32>
    %170 = arith.addf %169, %145 : vector<16x32xf32>
    %c0_69 = arith.constant 0 : index
    %c0_70 = arith.constant 0 : index
    %c0_71 = arith.constant 0 : index
    %171 = vector.load %arg14[%c0_69, %c0_70, %c0_71] : memref<2x1x32xf32, #tpu.memory_space<vmem>>, vector<1x1x32xf32>
    %172 = vector.shape_cast %171 : vector<1x1x32xf32> to vector<1x32xf32>
    %c0_72 = arith.constant 0 : index
    %c0_73 = arith.constant 0 : index
    %c0_74 = arith.constant 0 : index
    %173 = vector.load %arg15[%c0_72, %c0_73, %c0_74] : memref<2x1x32xf32, #tpu.memory_space<vmem>>, vector<1x1x32xf32>
    %174 = vector.shape_cast %173 : vector<1x1x32xf32> to vector<1x32xf32>
    %cst_75 = arith.constant dense<0.000000e+00> : vector<16xf32>
    %175 = vector.multi_reduction <add>, %170, %cst_75 [1] : vector<16x32xf32> to vector<16xf32>
    %176 = vector.shape_cast %175 : vector<16xf32> to vector<16x1xf32>
    %cst_76 = arith.constant 3.200000e+01 : f32
    %177 = vector.broadcast %cst_76 : f32 to vector<16x1xf32>
    %178 = arith.divf %176, %177 : vector<16x1xf32>
    %179 = vector.broadcast %178 : vector<16x1xf32> to vector<16x32xf32>
    %180 = arith.subf %170, %179 : vector<16x32xf32>
    %181 = arith.mulf %180, %180 : vector<16x32xf32>
    %cst_77 = arith.constant dense<0.000000e+00> : vector<16xf32>
    %182 = vector.multi_reduction <add>, %181, %cst_77 [1] : vector<16x32xf32> to vector<16xf32>
    %183 = vector.shape_cast %182 : vector<16xf32> to vector<16x1xf32>
    %cst_78 = arith.constant 3.200000e+01 : f32
    %184 = vector.broadcast %cst_78 : f32 to vector<16x1xf32>
    %185 = arith.divf %183, %184 : vector<16x1xf32>
    %cst_79 = arith.constant 9.99999996E-13 : f32
    %186 = vector.broadcast %cst_79 : f32 to vector<16x1xf32>
    %187 = arith.addf %185, %186 : vector<16x1xf32>
    %188 = math.rsqrt %187 : vector<16x1xf32>
    %189 = vector.broadcast %188 : vector<16x1xf32> to vector<16x32xf32>
    %190 = arith.mulf %180, %189 : vector<16x32xf32>
    %191 = vector.broadcast %172 : vector<1x32xf32> to vector<16x32xf32>
    %192 = arith.mulf %190, %191 : vector<16x32xf32>
    %193 = vector.broadcast %174 : vector<1x32xf32> to vector<16x32xf32>
    %194 = arith.addf %192, %193 : vector<16x32xf32>
    %c1 = arith.constant 1 : index
    %c0_80 = arith.constant 0 : index
    %c0_81 = arith.constant 0 : index
    %195 = vector.load %arg4[%c1, %c0_80, %c0_81] : memref<2x32x96xbf16, #tpu.memory_space<vmem>>, vector<1x32x96xbf16>
    %196 = vector.shape_cast %195 : vector<1x32x96xbf16> to vector<32x96xbf16>
    %197 = arith.truncf %194 : vector<16x32xf32> to vector<16x32xbf16>
    %cst_82 = arith.constant dense<0.000000e+00> : vector<16x96xf32>
    %198 = tpu.matmul %197, %196, %cst_82 {dimension_numbers = #tpu.dot_dimension_numbers<[1], [0], [0], [1], [0, 0, 1, 1], [], []>} : vector<16x32xbf16>, vector<32x96xbf16>, vector<16x96xf32> -> vector<16x96xf32>
    %c1_83 = arith.constant 1 : index
    %c0_84 = arith.constant 0 : index
    %c0_85 = arith.constant 0 : index
    %199 = vector.load %arg5[%c1_83, %c0_84, %c0_85] : memref<2x1x96xf32, #tpu.memory_space<vmem>>, vector<1x1x96xf32>
    %200 = vector.shape_cast %199 : vector<1x1x96xf32> to vector<1x96xf32>
    %201 = vector.broadcast %200 : vector<1x96xf32> to vector<16x96xf32>
    %202 = arith.addf %198, %201 : vector<16x96xf32>
    %203 = vector.extract_strided_slice %23 {offsets = [0, 0], sizes = [1, 8], strides = [1, 1]} : vector<2x8xf32> to vector<1x8xf32>
    %204 = vector.extract_strided_slice %202 {offsets = [0, 0], sizes = [8, 16], strides = [1, 1]} : vector<16x96xf32> to vector<8x16xf32>
    %205 = arith.truncf %204 : vector<8x16xf32> to vector<8x16xbf16>
    %206 = vector.extract_strided_slice %202 {offsets = [0, 32], sizes = [8, 16], strides = [1, 1]} : vector<16x96xf32> to vector<8x16xf32>
    %207 = arith.truncf %206 : vector<8x16xf32> to vector<8x16xbf16>
    %208 = vector.extract_strided_slice %202 {offsets = [0, 64], sizes = [8, 16], strides = [1, 1]} : vector<16x96xf32> to vector<8x16xf32>
    %209 = arith.truncf %208 : vector<8x16xf32> to vector<8x16xbf16>
    %cst_86 = arith.constant dense<0.000000e+00> : vector<8x8xf32>
    %210 = tpu.matmul %205, %207, %cst_86 {dimension_numbers = #tpu.dot_dimension_numbers<[1], [1], [0], [0], [0, 0, 1, 0], [], []>} : vector<8x16xbf16>, vector<8x16xbf16>, vector<8x8xf32> -> vector<8x8xf32>
    %cst_87 = arith.constant 2.500000e-01 : f32
    %211 = vector.broadcast %cst_87 : f32 to vector<8x8xf32>
    %212 = arith.mulf %210, %211 : vector<8x8xf32>
    %213 = vector.broadcast %203 : vector<1x8xf32> to vector<8x8xf32>
    %214 = arith.addf %212, %213 : vector<8x8xf32>
    %215 = math.exp %214 : vector<8x8xf32>
    %cst_88 = arith.constant dense<0.000000e+00> : vector<8xf32>
    %216 = vector.multi_reduction <add>, %215, %cst_88 [1] : vector<8x8xf32> to vector<8xf32>
    %217 = vector.shape_cast %216 : vector<8xf32> to vector<8x1xf32>
    %218 = tpu.reciprocal %217 {approx = true} : vector<8x1xf32> -> vector<8x1xf32>
    %219 = vector.broadcast %218 : vector<8x1xf32> to vector<8x8xf32>
    %220 = arith.mulf %215, %219 : vector<8x8xf32>
    %221 = arith.truncf %220 : vector<8x8xf32> to vector<8x8xbf16>
    %cst_89 = arith.constant dense<0.000000e+00> : vector<8x16xf32>
    %222 = tpu.matmul %221, %209, %cst_89 {dimension_numbers = #tpu.dot_dimension_numbers<[1], [0], [0], [1], [0, 0, 1, 1], [], []>} : vector<8x8xbf16>, vector<8x16xbf16>, vector<8x16xf32> -> vector<8x16xf32>
    %223 = vector.extract_strided_slice %202 {offsets = [0, 16], sizes = [8, 16], strides = [1, 1]} : vector<16x96xf32> to vector<8x16xf32>
    %224 = arith.truncf %223 : vector<8x16xf32> to vector<8x16xbf16>
    %225 = vector.extract_strided_slice %202 {offsets = [0, 48], sizes = [8, 16], strides = [1, 1]} : vector<16x96xf32> to vector<8x16xf32>
    %226 = arith.truncf %225 : vector<8x16xf32> to vector<8x16xbf16>
    %227 = vector.extract_strided_slice %202 {offsets = [0, 80], sizes = [8, 16], strides = [1, 1]} : vector<16x96xf32> to vector<8x16xf32>
    %228 = arith.truncf %227 : vector<8x16xf32> to vector<8x16xbf16>
    %cst_90 = arith.constant dense<0.000000e+00> : vector<8x8xf32>
    %229 = tpu.matmul %224, %226, %cst_90 {dimension_numbers = #tpu.dot_dimension_numbers<[1], [1], [0], [0], [0, 0, 1, 0], [], []>} : vector<8x16xbf16>, vector<8x16xbf16>, vector<8x8xf32> -> vector<8x8xf32>
    %cst_91 = arith.constant 2.500000e-01 : f32
    %230 = vector.broadcast %cst_91 : f32 to vector<8x8xf32>
    %231 = arith.mulf %229, %230 : vector<8x8xf32>
    %232 = vector.broadcast %203 : vector<1x8xf32> to vector<8x8xf32>
    %233 = arith.addf %231, %232 : vector<8x8xf32>
    %234 = math.exp %233 : vector<8x8xf32>
    %cst_92 = arith.constant dense<0.000000e+00> : vector<8xf32>
    %235 = vector.multi_reduction <add>, %234, %cst_92 [1] : vector<8x8xf32> to vector<8xf32>
    %236 = vector.shape_cast %235 : vector<8xf32> to vector<8x1xf32>
    %237 = tpu.reciprocal %236 {approx = true} : vector<8x1xf32> -> vector<8x1xf32>
    %238 = vector.broadcast %237 : vector<8x1xf32> to vector<8x8xf32>
    %239 = arith.mulf %234, %238 : vector<8x8xf32>
    %240 = arith.truncf %239 : vector<8x8xf32> to vector<8x8xbf16>
    %cst_93 = arith.constant dense<0.000000e+00> : vector<8x16xf32>
    %241 = tpu.matmul %240, %228, %cst_93 {dimension_numbers = #tpu.dot_dimension_numbers<[1], [0], [0], [1], [0, 0, 1, 1], [], []>} : vector<8x8xbf16>, vector<8x16xbf16>, vector<8x16xf32> -> vector<8x16xf32>
    %242 = tpu.concatenate %222, %241 in 1 : vector<8x16xf32>, vector<8x16xf32> -> vector<8x32xf32>
    %243 = vector.extract_strided_slice %23 {offsets = [1, 0], sizes = [1, 8], strides = [1, 1]} : vector<2x8xf32> to vector<1x8xf32>
    %244 = vector.extract_strided_slice %202 {offsets = [8, 0], sizes = [8, 16], strides = [1, 1]} : vector<16x96xf32> to vector<8x16xf32>
    %245 = arith.truncf %244 : vector<8x16xf32> to vector<8x16xbf16>
    %246 = vector.extract_strided_slice %202 {offsets = [8, 32], sizes = [8, 16], strides = [1, 1]} : vector<16x96xf32> to vector<8x16xf32>
    %247 = arith.truncf %246 : vector<8x16xf32> to vector<8x16xbf16>
    %248 = vector.extract_strided_slice %202 {offsets = [8, 64], sizes = [8, 16], strides = [1, 1]} : vector<16x96xf32> to vector<8x16xf32>
    %249 = arith.truncf %248 : vector<8x16xf32> to vector<8x16xbf16>
    %cst_94 = arith.constant dense<0.000000e+00> : vector<8x8xf32>
    %250 = tpu.matmul %245, %247, %cst_94 {dimension_numbers = #tpu.dot_dimension_numbers<[1], [1], [0], [0], [0, 0, 1, 0], [], []>} : vector<8x16xbf16>, vector<8x16xbf16>, vector<8x8xf32> -> vector<8x8xf32>
    %cst_95 = arith.constant 2.500000e-01 : f32
    %251 = vector.broadcast %cst_95 : f32 to vector<8x8xf32>
    %252 = arith.mulf %250, %251 : vector<8x8xf32>
    %253 = vector.broadcast %243 : vector<1x8xf32> to vector<8x8xf32>
    %254 = arith.addf %252, %253 : vector<8x8xf32>
    %255 = math.exp %254 : vector<8x8xf32>
    %cst_96 = arith.constant dense<0.000000e+00> : vector<8xf32>
    %256 = vector.multi_reduction <add>, %255, %cst_96 [1] : vector<8x8xf32> to vector<8xf32>
    %257 = vector.shape_cast %256 : vector<8xf32> to vector<8x1xf32>
    %258 = tpu.reciprocal %257 {approx = true} : vector<8x1xf32> -> vector<8x1xf32>
    %259 = vector.broadcast %258 : vector<8x1xf32> to vector<8x8xf32>
    %260 = arith.mulf %255, %259 : vector<8x8xf32>
    %261 = arith.truncf %260 : vector<8x8xf32> to vector<8x8xbf16>
    %cst_97 = arith.constant dense<0.000000e+00> : vector<8x16xf32>
    %262 = tpu.matmul %261, %249, %cst_97 {dimension_numbers = #tpu.dot_dimension_numbers<[1], [0], [0], [1], [0, 0, 1, 1], [], []>} : vector<8x8xbf16>, vector<8x16xbf16>, vector<8x16xf32> -> vector<8x16xf32>
    %263 = vector.extract_strided_slice %202 {offsets = [8, 16], sizes = [8, 16], strides = [1, 1]} : vector<16x96xf32> to vector<8x16xf32>
    %264 = arith.truncf %263 : vector<8x16xf32> to vector<8x16xbf16>
    %265 = vector.extract_strided_slice %202 {offsets = [8, 48], sizes = [8, 16], strides = [1, 1]} : vector<16x96xf32> to vector<8x16xf32>
    %266 = arith.truncf %265 : vector<8x16xf32> to vector<8x16xbf16>
    %267 = vector.extract_strided_slice %202 {offsets = [8, 80], sizes = [8, 16], strides = [1, 1]} : vector<16x96xf32> to vector<8x16xf32>
    %268 = arith.truncf %267 : vector<8x16xf32> to vector<8x16xbf16>
    %cst_98 = arith.constant dense<0.000000e+00> : vector<8x8xf32>
    %269 = tpu.matmul %264, %266, %cst_98 {dimension_numbers = #tpu.dot_dimension_numbers<[1], [1], [0], [0], [0, 0, 1, 0], [], []>} : vector<8x16xbf16>, vector<8x16xbf16>, vector<8x8xf32> -> vector<8x8xf32>
    %cst_99 = arith.constant 2.500000e-01 : f32
    %270 = vector.broadcast %cst_99 : f32 to vector<8x8xf32>
    %271 = arith.mulf %269, %270 : vector<8x8xf32>
    %272 = vector.broadcast %243 : vector<1x8xf32> to vector<8x8xf32>
    %273 = arith.addf %271, %272 : vector<8x8xf32>
    %274 = math.exp %273 : vector<8x8xf32>
    %cst_100 = arith.constant dense<0.000000e+00> : vector<8xf32>
    %275 = vector.multi_reduction <add>, %274, %cst_100 [1] : vector<8x8xf32> to vector<8xf32>
    %276 = vector.shape_cast %275 : vector<8xf32> to vector<8x1xf32>
    %277 = tpu.reciprocal %276 {approx = true} : vector<8x1xf32> -> vector<8x1xf32>
    %278 = vector.broadcast %277 : vector<8x1xf32> to vector<8x8xf32>
    %279 = arith.mulf %274, %278 : vector<8x8xf32>
    %280 = arith.truncf %279 : vector<8x8xf32> to vector<8x8xbf16>
    %cst_101 = arith.constant dense<0.000000e+00> : vector<8x16xf32>
    %281 = tpu.matmul %280, %268, %cst_101 {dimension_numbers = #tpu.dot_dimension_numbers<[1], [0], [0], [1], [0, 0, 1, 1], [], []>} : vector<8x8xbf16>, vector<8x16xbf16>, vector<8x16xf32> -> vector<8x16xf32>
    %282 = tpu.concatenate %262, %281 in 1 : vector<8x16xf32>, vector<8x16xf32> -> vector<8x32xf32>
    %283 = tpu.concatenate %242, %282 in 0 : vector<8x32xf32>, vector<8x32xf32> -> vector<16x32xf32>
    %c1_102 = arith.constant 1 : index
    %c0_103 = arith.constant 0 : index
    %c0_104 = arith.constant 0 : index
    %284 = vector.load %arg6[%c1_102, %c0_103, %c0_104] : memref<2x32x32xbf16, #tpu.memory_space<vmem>>, vector<1x32x32xbf16>
    %285 = vector.shape_cast %284 : vector<1x32x32xbf16> to vector<32x32xbf16>
    %286 = arith.truncf %283 : vector<16x32xf32> to vector<16x32xbf16>
    %cst_105 = arith.constant dense<0.000000e+00> : vector<16x32xf32>
    %287 = tpu.matmul %286, %285, %cst_105 {dimension_numbers = #tpu.dot_dimension_numbers<[1], [0], [0], [1], [0, 0, 1, 1], [], []>} : vector<16x32xbf16>, vector<32x32xbf16>, vector<16x32xf32> -> vector<16x32xf32>
    %c1_106 = arith.constant 1 : index
    %c0_107 = arith.constant 0 : index
    %c0_108 = arith.constant 0 : index
    %288 = vector.load %arg7[%c1_106, %c0_107, %c0_108] : memref<2x1x32xf32, #tpu.memory_space<vmem>>, vector<1x1x32xf32>
    %289 = vector.shape_cast %288 : vector<1x1x32xf32> to vector<1x32xf32>
    %290 = vector.broadcast %289 : vector<1x32xf32> to vector<16x32xf32>
    %291 = arith.addf %287, %290 : vector<16x32xf32>
    %292 = arith.addf %291, %194 : vector<16x32xf32>
    %c1_109 = arith.constant 1 : index
    %c0_110 = arith.constant 0 : index
    %c0_111 = arith.constant 0 : index
    %293 = vector.load %arg8[%c1_109, %c0_110, %c0_111] : memref<2x1x32xf32, #tpu.memory_space<vmem>>, vector<1x1x32xf32>
    %294 = vector.shape_cast %293 : vector<1x1x32xf32> to vector<1x32xf32>
    %c1_112 = arith.constant 1 : index
    %c0_113 = arith.constant 0 : index
    %c0_114 = arith.constant 0 : index
    %295 = vector.load %arg9[%c1_112, %c0_113, %c0_114] : memref<2x1x32xf32, #tpu.memory_space<vmem>>, vector<1x1x32xf32>
    %296 = vector.shape_cast %295 : vector<1x1x32xf32> to vector<1x32xf32>
    %cst_115 = arith.constant dense<0.000000e+00> : vector<16xf32>
    %297 = vector.multi_reduction <add>, %292, %cst_115 [1] : vector<16x32xf32> to vector<16xf32>
    %298 = vector.shape_cast %297 : vector<16xf32> to vector<16x1xf32>
    %cst_116 = arith.constant 3.200000e+01 : f32
    %299 = vector.broadcast %cst_116 : f32 to vector<16x1xf32>
    %300 = arith.divf %298, %299 : vector<16x1xf32>
    %301 = vector.broadcast %300 : vector<16x1xf32> to vector<16x32xf32>
    %302 = arith.subf %292, %301 : vector<16x32xf32>
    %303 = arith.mulf %302, %302 : vector<16x32xf32>
    %cst_117 = arith.constant dense<0.000000e+00> : vector<16xf32>
    %304 = vector.multi_reduction <add>, %303, %cst_117 [1] : vector<16x32xf32> to vector<16xf32>
    %305 = vector.shape_cast %304 : vector<16xf32> to vector<16x1xf32>
    %cst_118 = arith.constant 3.200000e+01 : f32
    %306 = vector.broadcast %cst_118 : f32 to vector<16x1xf32>
    %307 = arith.divf %305, %306 : vector<16x1xf32>
    %cst_119 = arith.constant 9.99999996E-13 : f32
    %308 = vector.broadcast %cst_119 : f32 to vector<16x1xf32>
    %309 = arith.addf %307, %308 : vector<16x1xf32>
    %310 = math.rsqrt %309 : vector<16x1xf32>
    %311 = vector.broadcast %310 : vector<16x1xf32> to vector<16x32xf32>
    %312 = arith.mulf %302, %311 : vector<16x32xf32>
    %313 = vector.broadcast %294 : vector<1x32xf32> to vector<16x32xf32>
    %314 = arith.mulf %312, %313 : vector<16x32xf32>
    %315 = vector.broadcast %296 : vector<1x32xf32> to vector<16x32xf32>
    %316 = arith.addf %314, %315 : vector<16x32xf32>
    %c1_120 = arith.constant 1 : index
    %c0_121 = arith.constant 0 : index
    %c0_122 = arith.constant 0 : index
    %317 = vector.load %arg10[%c1_120, %c0_121, %c0_122] : memref<2x32x64xbf16, #tpu.memory_space<vmem>>, vector<1x32x64xbf16>
    %318 = vector.shape_cast %317 : vector<1x32x64xbf16> to vector<32x64xbf16>
    %319 = arith.truncf %316 : vector<16x32xf32> to vector<16x32xbf16>
    %cst_123 = arith.constant dense<0.000000e+00> : vector<16x64xf32>
    %320 = tpu.matmul %319, %318, %cst_123 {dimension_numbers = #tpu.dot_dimension_numbers<[1], [0], [0], [1], [0, 0, 1, 1], [], []>} : vector<16x32xbf16>, vector<32x64xbf16>, vector<16x64xf32> -> vector<16x64xf32>
    %c1_124 = arith.constant 1 : index
    %c0_125 = arith.constant 0 : index
    %c0_126 = arith.constant 0 : index
    %321 = vector.load %arg11[%c1_124, %c0_125, %c0_126] : memref<2x1x64xf32, #tpu.memory_space<vmem>>, vector<1x1x64xf32>
    %322 = vector.shape_cast %321 : vector<1x1x64xf32> to vector<1x64xf32>
    %323 = vector.broadcast %322 : vector<1x64xf32> to vector<16x64xf32>
    %324 = arith.addf %320, %323 : vector<16x64xf32>
    %cst_127 = arith.constant 5.000000e-01 : f32
    %325 = vector.broadcast %cst_127 : f32 to vector<16x64xf32>
    %326 = arith.mulf %325, %324 : vector<16x64xf32>
    %cst_128 = arith.constant 0.707106769 : f32
    %327 = vector.broadcast %cst_128 : f32 to vector<16x64xf32>
    %328 = arith.mulf %324, %327 : vector<16x64xf32>
    %329 = math.erf %328 : vector<16x64xf32>
    %cst_129 = arith.constant 1.000000e+00 : f32
    %330 = vector.broadcast %cst_129 : f32 to vector<16x64xf32>
    %331 = arith.addf %330, %329 : vector<16x64xf32>
    %332 = arith.mulf %326, %331 : vector<16x64xf32>
    %c1_130 = arith.constant 1 : index
    %c0_131 = arith.constant 0 : index
    %c0_132 = arith.constant 0 : index
    %333 = vector.load %arg12[%c1_130, %c0_131, %c0_132] : memref<2x64x32xbf16, #tpu.memory_space<vmem>>, vector<1x64x32xbf16>
    %334 = vector.shape_cast %333 : vector<1x64x32xbf16> to vector<64x32xbf16>
    %335 = arith.truncf %332 : vector<16x64xf32> to vector<16x64xbf16>
    %cst_133 = arith.constant dense<0.000000e+00> : vector<16x32xf32>
    %336 = tpu.matmul %335, %334, %cst_133 {dimension_numbers = #tpu.dot_dimension_numbers<[1], [0], [0], [1], [0, 0, 1, 1], [], []>} : vector<16x64xbf16>, vector<64x32xbf16>, vector<16x32xf32> -> vector<16x32xf32>
    %c1_134 = arith.constant 1 : index
    %c0_135 = arith.constant 0 : index
    %c0_136 = arith.constant 0 : index
    %337 = vector.load %arg13[%c1_134, %c0_135, %c0_136] : memref<2x1x32xf32, #tpu.memory_space<vmem>>, vector<1x1x32xf32>
    %338 = vector.shape_cast %337 : vector<1x1x32xf32> to vector<1x32xf32>
    %339 = vector.broadcast %338 : vector<1x32xf32> to vector<16x32xf32>
    %340 = arith.addf %336, %339 : vector<16x32xf32>
    %341 = arith.addf %340, %316 : vector<16x32xf32>
    %c1_137 = arith.constant 1 : index
    %c0_138 = arith.constant 0 : index
    %c0_139 = arith.constant 0 : index
    %342 = vector.load %arg14[%c1_137, %c0_138, %c0_139] : memref<2x1x32xf32, #tpu.memory_space<vmem>>, vector<1x1x32xf32>
    %343 = vector.shape_cast %342 : vector<1x1x32xf32> to vector<1x32xf32>
    %c1_140 = arith.constant 1 : index
    %c0_141 = arith.constant 0 : index
    %c0_142 = arith.constant 0 : index
    %344 = vector.load %arg15[%c1_140, %c0_141, %c0_142] : memref<2x1x32xf32, #tpu.memory_space<vmem>>, vector<1x1x32xf32>
    %345 = vector.shape_cast %344 : vector<1x1x32xf32> to vector<1x32xf32>
    %cst_143 = arith.constant dense<0.000000e+00> : vector<16xf32>
    %346 = vector.multi_reduction <add>, %341, %cst_143 [1] : vector<16x32xf32> to vector<16xf32>
    %347 = vector.shape_cast %346 : vector<16xf32> to vector<16x1xf32>
    %cst_144 = arith.constant 3.200000e+01 : f32
    %348 = vector.broadcast %cst_144 : f32 to vector<16x1xf32>
    %349 = arith.divf %347, %348 : vector<16x1xf32>
    %350 = vector.broadcast %349 : vector<16x1xf32> to vector<16x32xf32>
    %351 = arith.subf %341, %350 : vector<16x32xf32>
    %352 = arith.mulf %351, %351 : vector<16x32xf32>
    %cst_145 = arith.constant dense<0.000000e+00> : vector<16xf32>
    %353 = vector.multi_reduction <add>, %352, %cst_145 [1] : vector<16x32xf32> to vector<16xf32>
    %354 = vector.shape_cast %353 : vector<16xf32> to vector<16x1xf32>
    %cst_146 = arith.constant 3.200000e+01 : f32
    %355 = vector.broadcast %cst_146 : f32 to vector<16x1xf32>
    %356 = arith.divf %354, %355 : vector<16x1xf32>
    %cst_147 = arith.constant 9.99999996E-13 : f32
    %357 = vector.broadcast %cst_147 : f32 to vector<16x1xf32>
    %358 = arith.addf %356, %357 : vector<16x1xf32>
    %359 = math.rsqrt %358 : vector<16x1xf32>
    %360 = vector.broadcast %359 : vector<16x1xf32> to vector<16x32xf32>
    %361 = arith.mulf %351, %360 : vector<16x32xf32>
    %362 = vector.broadcast %343 : vector<1x32xf32> to vector<16x32xf32>
    %363 = arith.mulf %361, %362 : vector<16x32xf32>
    %364 = vector.broadcast %345 : vector<1x32xf32> to vector<16x32xf32>
    %365 = arith.addf %363, %364 : vector<16x32xf32>
    %366 = vector.extract_strided_slice %365 {offsets = [0, 0], sizes = [8, 32], strides = [1, 1]} : vector<16x32xf32> to vector<8x32xf32>
    %cst_148 = arith.constant dense<0xFF800000> : vector<32xf32>
    %367 = vector.multi_reduction <maximumf>, %366, %cst_148 [0] : vector<8x32xf32> to vector<32xf32>
    %368 = vector.shape_cast %367 : vector<32xf32> to vector<1x32xf32>
    %369 = vector.extract_strided_slice %365 {offsets = [8, 0], sizes = [8, 32], strides = [1, 1]} : vector<16x32xf32> to vector<8x32xf32>
    %cst_149 = arith.constant dense<0xFF800000> : vector<32xf32>
    %370 = vector.multi_reduction <maximumf>, %369, %cst_149 [0] : vector<8x32xf32> to vector<32xf32>
    %371 = vector.shape_cast %370 : vector<32xf32> to vector<1x32xf32>
    %372 = tpu.concatenate %368, %371 in 0 : vector<1x32xf32>, vector<1x32xf32> -> vector<2x32xf32>
    %c0_150 = arith.constant 0 : index
    %c0_151 = arith.constant 0 : index
    %373 = vector.load %arg16[%c0_150, %c0_151] : memref<32x3xbf16, #tpu.memory_space<vmem>>, vector<32x3xbf16>
    %374 = arith.truncf %372 : vector<2x32xf32> to vector<2x32xbf16>
    %cst_152 = arith.constant dense<0.000000e+00> : vector<2x3xf32>
    %375 = tpu.matmul %374, %373, %cst_152 {dimension_numbers = #tpu.dot_dimension_numbers<[1], [0], [0], [1], [0, 0, 1, 1], [], []>} : vector<2x32xbf16>, vector<32x3xbf16>, vector<2x3xf32> -> vector<2x3xf32>
    %c0_153 = arith.constant 0 : index
    %c0_154 = arith.constant 0 : index
    %376 = vector.load %arg17[%c0_153, %c0_154] : memref<1x3xf32, #tpu.memory_space<vmem>>, vector<1x3xf32>
    %377 = vector.broadcast %376 : vector<1x3xf32> to vector<2x3xf32>
    %378 = arith.addf %375, %377 : vector<2x3xf32>
    %c0_155 = arith.constant 0 : index
    %c0_156 = arith.constant 0 : index
    %379 = vector.load %arg18[%c0_155, %c0_156] : memref<2x3xf32, #tpu.memory_space<vmem>>, vector<2x3xf32>
    tpu.vector_store %arg18[%c0_155, %c0_156], %378 {strides = array<i32>} : memref<2x3xf32, #tpu.memory_space<vmem>>, vector<2x3xf32>,
    return
  }
}

</mosaic_0001>

<bundles_post_ra>
// kernel: hbert_forward.1
= control target key start
LH: loop header
LB: loop body
LE: loop exit
PB: predicated region body
PF: predicated region fallthrough
CT: control target
= control target key end

     0   :  { %s2837_s0 = inlined_call_operand.vmem [shape: f32[16,32], index: 0, kind: input, shape index: {}]   ;;  %s2838_s1 = inlined_call_operand.vmem [shape: f32[2,8], index: 1, kind: input, shape index: {}]   ;;  %s2839_s2 = inlined_call_operand.vmem [shape: f32[1,32], index: 2, kind: input, shape index: {}]   ;;  %s2840_s3 = inlined_call_operand.vmem [shape: f32[1,32], index: 3, kind: input, shape index: {}]   ;;  %s2841_s4 = inlined_call_operand.vmem [shape: bf16[2,32,96], index: 4, kind: input, shape index: {}]   ;;  %s2842_s5 = inlined_call_operand.vmem [shape: f32[2,1,96], index: 5, kind: input, shape index: {}]   ;;  %s2843_s6 = inlined_call_operand.vmem [shape: bf16[2,32,32], index: 6, kind: input, shape index: {}]   ;;  %s2844_s7 = inlined_call_operand.vmem [shape: f32[2,1,32], index: 7, kind: input, shape index: {}]   ;;  %s2845_s8 = inlined_call_operand.vmem [shape: f32[2,1,32], index: 8, kind: input, shape index: {}]   ;;  %s2846_s9 = inlined_call_operand.vmem [shape: f32[2,1,32], index: 9, kind: input, shape index: {}]   ;;  %s2847_s10 = inlined_call_operand.vmem [shape: bf16[2,32,64], index: 10, kind: input, shape index: {}]   ;;  %s2848_s11 = inlined_call_operand.vmem [shape: f32[2,1,64], index: 11, kind: input, shape index: {}]   ;;  %s2849_s12 = inlined_call_operand.vmem [shape: bf16[2,64,32], index: 12, kind: input, shape index: {}]   ;;  %s2850_s13 = inlined_call_operand.vmem [shape: f32[2,1,32], index: 13, kind: input, shape index: {}]   ;;  %s2851_s14 = inlined_call_operand.vmem [shape: f32[2,1,32], index: 14, kind: input, shape index: {}]   ;;  %s2852_s15 = inlined_call_operand.vmem [shape: f32[2,1,32], index: 15, kind: input, shape index: {}]   ;;  %s2853_s16 = inlined_call_operand.vmem [shape: bf16[32,3], index: 16, kind: input, shape index: {}]   ;;  %s2854_s17 = inlined_call_operand.vmem [shape: f32[1,3], index: 17, kind: input, shape index: {}]   ;;  %s2855_s18 = inlined_call_operand.hbm [shape: f32[2,3], index: 18, kind: output, shape index: {}]  }
   0x1   :  { %2857 = sst [smem:[#allocation5_spill]] %s2837_s0 }
   0x2   :  { %2858 = sst [smem:[#allocation6_spill]] %s2838_s1 }
   0x3   :  { %2859 = sst [smem:[#allocation7_spill]] %s2839_s2 }
   0x4   :  { %s2860_s29 = sld [smem:[#allocation5_spill]]  ;;  %vm65_vm0 = vcmask 261120  }
   0xa   :  { %v61_v0 = vld [vmem:[%s2860_s29] sm:$0xff]  ;;  %v62_v1 = vld [vmem:[%s2860_s29 + $0x8] sm:$0xff] }
   0xb   :  { %v66_v2 = vsel %vm65_vm0, %v61_v0, 0.0  ;;  %v69_v3 = vsel %vm65_vm0, %v62_v1, 0.0 }
   0xc   :  { %67 = vadd.xlane.f32.xlu0 %v66_v2 }
  0x10   :  { %70 = vadd.xlane.f32.xlu0 %v69_v3 }
  0x11   :  { %23 = vsyncpa [#allocation3], 0  ;;  %v2249_v14 = vld [vmem:[%s2841_s4 + $0x8] sm:$0xff]   ;;  %v2353_v15 = vmov 0.0   ;;  %vm2354_vm1 = vmmov 0   ;;  %v2250_v16 = vld [vmem:[%s2841_s4] sm:$0xff]   ;;  %v230_v53 = vlaneseq }
  0x12   :  { %2054 = vmatprep.subr.bf16.mxu0 %v2353_v15  ;;  %2058 = vmatprep.mubr.msk.bf16.mxu0 %vm2354_vm1, %v2353_v15  ;;  %s2861_s23 = sld [smem:[#allocation7_spill]]  ;;  %v1898_v29 = vld [vmem:[%s2840_s3] ss:$0 sm:$0xff]  ;;  %s2355_s3 = smov 80   ;;  %vm182_vm2 = vcmask 130048   ;;  %vm237_vm3 = vcmask 64512  }
  0x13   :  { %2055 = vmatpush3.bf16.msra.mxu0 %v2249_v14  ;;  %2062 = vmatprep.subr.bf16.mxu1 %v2353_v15  ;;  %v1899_v34 = vld [vmem:[%s2842_s5] ss:$0 sm:$0xff]  ;;  %s2356_s28 = smov 96   ;;  %s2357_s29 = smov 112   ;;  %v231_v54 = vshrl.u32 %v230_v53, 7  ;;  %vm249_vm4 = vcmask 1043456  }
  0x14   :  { %2056 = vmatprep.subr.bf16.mxu0 %v2353_v15  ;;  %2064 = vmatprep.mubr.msk.bf16.mxu1 %vm2354_vm1, %v2353_v15  ;;  %s2862_s19 = sld [smem:[#allocation6_spill]]  ;;  %s2358_s1 = smov 48   ;;  %vm863_vm5 = vcmask 523264   ;;  %vm1812_vm6 = vcmask 1040384   ;;  %vm1881_vm7 = vcmask 17408  }
  0x15   :  { %v232_v55 = vsub.s32 0, %v231_v54  ;;  %s2359_s20 = smov 64   ;;  %s2360_s24 = smov 16  }
  0x17   :  { %2057 = vmatpush3.bf16.msra.mxu0 %v2250_v16 }
  0x18   :  { %2068 = vmatprep.subr.bf16.mxu0 %v2353_v15  ;;  %v1897_v25 = vld [vmem:[%s2861_s23] ss:$0 sm:$0xff] }
  0x1a   :  { %v109_v56 = vld [vmem:[%s2862_s19] sm:$0x3] }
  0x1b   :  { %v2540_v57 = vrot.slane %v109_v56, %v232_v55 }
  0x95   :  { %v68_v4 = vpop.xlane.xlu0 %67 }
  0x96   :  { %v73_v5 = vmul.f32 0.03125, %v68_v4 }
  0x98   :  { %v75_v6 = vsub.f32 %v61_v0, %v73_v5  ;;  %v459_v5 = vsub.s32 1, %v231_v54 }
  0x99   :  { %v71_v7 = vpop.xlane.xlu0 %70 }
  0x9a   :  { %v74_v8 = vmul.f32 0.03125, %v71_v7  ;;  %v77_v9 = vmul.f32 %v75_v6, %v75_v6 }
  0x9c   :  { %v76_v10 = vsub.f32 %v62_v1, %v74_v8  ;;  %v79_v11 = vsel %vm65_vm0, %v77_v9, 0.0  ;;  %v2544_v9 = vrot.slane %v109_v56, %v459_v5  ;;  %v2252_v5 = vld [vmem:[%s2843_s6] sm:$0xff]  }
  0x9d   :  { %80 = vadd.xlane.f32.xlu1 %v79_v11 }
  0x9e   :  { %v78_v12 = vmul.f32 %v76_v10, %v76_v10 }
  0xa0   :  { %v82_v13 = vsel %vm65_vm0, %v78_v12, 0.0 }
  0xa1   :  { %83 = vadd.xlane.f32.xlu1 %v82_v13 }
 0x126   :  { %v81_v17 = vpop.xlane.xlu1 %80 }
 0x127   :  { %v85_v18 = vmul.f32 0.03125, %v81_v17 }
 0x129   :  { %v87_v19 = vadd.f32 1e-12, %v85_v18 }
 0x12a   :  { %v84_v20 = vpop.xlane.xlu1 %83 }
 0x12b   :  { %2271 = vrsqrt.f32 %v87_v19  ;;  %v86_v21 = vmul.f32 0.03125, %v84_v20 }
 0x12d   :  { %v88_v22 = vadd.f32 1e-12, %v86_v21 }
 0x12f   :  { %2273 = vrsqrt.f32 %v88_v22 }
 0x138   :  { %v2272_v23 = vpop.eup %2271 }
 0x139   :  { %v91_v24 = vmul.f32 %v2272_v23, %v75_v6 }
 0x13b   :  { %v99_v28 = vmul.f32 %v1897_v25, %v91_v24 }
 0x13c   :  { %v2274_v26 = vpop.eup %2273 }
 0x13d   :  { %v92_v27 = vmul.f32 %v2274_v26, %v76_v10  ;;  %v2487_v31 = vadd.f32 %v1898_v29, %v99_v28 }
 0x13f   :  { %v100_v30 = vmul.f32 %v1897_v25, %v92_v27 }
 0x141   :  { %v2489_v32 = vadd.f32 %v1898_v29, %v100_v30 }
 0x143   :  { %v114_v33 = vpack.c.bf16 %v2489_v32, %v2487_v31 }
 0x145   :  { %2059 = vmatmul.mubr.msk.bf16.vlgmr.msra.gmra.mxu0 %vm65_vm0, %v114_v33 }
 0x146   :  { %2070 = vmatprep.mubr.msk.bf16.mxu0 %vm2354_vm1, %v2353_v15 }
 0x205   :  { %v171_v35 = vpop.f32.mrf.mxu0 }
 0x206   :  { %v172_v36 = vadd.f32 %v1899_v34, %v171_v35 }
 0x207   :  { %v2060_v37 = vpop.f32.mrf.mxu0 }
 0x208   :  { %v2499_v38 = vpack.c.bf16 %v172_v36, %v172_v36 }
 0x209   :  { %v174_v39 = vpop.f32.mrf.mxu0 }
 0x20a   :  { %v175_v40 = vadd.f32 %v1899_v34, %v174_v39  ;;  %295 = vrot.lane.b32.xlu1 %v2499_v38, %s2355_s3  ;;  %180 = vrot.lane.b32.xlu0 %v2499_v38, %s2356_s28 }
 0x20b   :  { %v2061_v41 = vpop.f32.mrf.mxu0 }
 0x20c   :  { %v2505_v42 = vpack.c.bf16 %v175_v40, %v175_v40 }
 0x20e   :  { %293 = vrot.lane.b32.xlu1 %v2499_v38, %s2357_s29  ;;  %520 = vrot.lane.b32.xlu0 %v2505_v42, %s2355_s3 }
 0x212   :  { %408 = vrot.lane.b32.xlu1 %v2505_v42, %s2356_s28 }
 0x216   :  { %518 = vrot.lane.b32.xlu1 %v2505_v42, %s2357_s29 }
 0x27c   :  { %v181_v43 = vpop.permute.xlu0 %180  ;;  %v296_v45 = vpop.permute.xlu1 %295 }
 0x27d   :  { %v187_v44 = vsel %vm182_vm2, %v181_v43, 0  ;;  %v301_v47 = vsel %vm182_vm2, %v296_v45, 0 }
 0x27e   :  { %2063 = vmatpush3.bf16.xpose.msra.mxu1 %v187_v44 }
 0x27f   :  { %2074 = vmatprep.subr.bf16.mxu1 %v2353_v15 }
 0x280   :  { %v294_v46 = vpop.permute.xlu1 %293  ;;  %v521_v50 = vpop.permute.xlu0 %520 }
 0x281   :  { %v526_v51 = vsel %vm182_vm2, %v521_v50, 0 }
 0x284   :  { %v409_v48 = vpop.permute.xlu1 %408 }
 0x285   :  { %2065 = vmatmul.mubr.msk.bf16.vlgmr.msra.gmra.mxu1 %vm182_vm2, %v2499_v38  ;;  %v414_v49 = vsel %vm182_vm2, %v409_v48, 0 }
 0x286   :  { %2075 = vmatpush3.bf16.xpose.msra.mxu1 %v301_v47  ;;  %2076 = vmatprep.mubr.msk.bf16.mxu1 %vm2354_vm1, %v2353_v15 }
 0x287   :  { %2086 = vmatprep.subr.bf16.mxu1 %v2353_v15 }
 0x288   :  { %v519_v52 = vpop.permute.xlu1 %518 }
 0x28d   :  { %2077 = vmatmul.mubr.msk.bf16.vlgmr.msra.gmra.mxu1 %vm182_vm2, %v294_v46 }
 0x28e   :  { %2087 = vmatpush3.bf16.xpose.msra.mxu1 %v414_v49  ;;  %2088 = vmatprep.mubr.msk.bf16.mxu1 %vm2354_vm1, %v2353_v15 }
 0x28f   :  { %2098 = vmatprep.subr.bf16.mxu1 %v2353_v15 }
 0x295   :  { %2089 = vmatmul.mubr.msk.bf16.vlgmr.msra.gmra.mxu1 %vm182_vm2, %v2505_v42 }
 0x296   :  { %2099 = vmatpush3.bf16.xpose.msra.mxu1 %v526_v51  ;;  %2100 = vmatprep.mubr.msk.bf16.mxu1 %vm2354_vm1, %v2353_v15 }
 0x297   :  { %2110 = vmatprep.subr.bf16.mxu1 %v2353_v15 }
 0x29d   :  { %2101 = vmatmul.mubr.msk.bf16.vlgmr.msra.gmra.mxu1 %vm182_vm2, %v519_v52 }
 0x29e   :  { %2114 = vmatprep.mubr.msk.bf16.mxu1 %vm2354_vm1, %v2353_v15 }
 0x345   :  { %v223_v58 = vpop.f32.mrf.mxu1 }
 0x346   :  { %v229_v59 = vmul.f32 0.25, %v223_v58 }
 0x347   :  { %v2066_v60 = vpop.f32.mrf.mxu1 }
 0x348   :  { %v234_v61 = vadd.f32 %v2540_v57, %v229_v59  ;;  %v2251_v60 = vld [vmem:[%s2843_s6 + $0x8] sm:$0xff]  }
 0x349   :  { %v226_v62 = vpop.f32.mrf.mxu1  ;;  %2111 = vmatpush3.bf16.msra.mxu1 %v2251_v60 }
 0x34a   :  { %v235_v63 = vmul.f32 1.442695, %v234_v61  ;;  %2112 = vmatprep.subr.bf16.mxu1 %v2353_v15 }
 0x34b   :  { %v2067_v0 = vpop.f32.mrf.mxu1 }
 0x34c   :  { %2275 = vpow2.f32 %v235_v63 }
 0x34d   :  { %v337_v1 = vpop.f32.mrf.mxu1  ;;  %2113 = vmatpush3.bf16.msra.mxu1 %v2252_v5 }
 0x34e   :  { %v343_v2 = vmul.f32 0.25, %v337_v1  ;;  %2126 = vmatprep.subr.bf16.mxu1 %v2353_v15 }
 0x34f   :  { %v2078_v3 = vpop.f32.mrf.mxu1 }
 0x350   :  { %v344_v4 = vadd.f32 %v343_v2, %v2540_v57 }
 0x351   :  { %v340_v6 = vpop.f32.mrf.mxu1 }
 0x352   :  { %v345_v7 = vmul.f32 1.442695, %v344_v4 }
 0x353   :  { %v2079_v8 = vpop.f32.mrf.mxu1 }
 0x354   :  { %2277 = vpow2.f32 %v345_v7 }
 0x355   :  { %v450_v10 = vpop.f32.mrf.mxu1 }
 0x356   :  { %v456_v11 = vmul.f32 0.25, %v450_v10 }
 0x357   :  { %v2090_v12 = vpop.f32.mrf.mxu1 }
 0x358   :  { %v461_v13 = vadd.f32 %v2544_v9, %v456_v11 }
 0x359   :  { %v2276_v14 = vpop.eup %2275  ;;  %v453_v16 = vpop.f32.mrf.mxu1 }
 0x35a   :  { %v462_v17 = vmul.f32 1.442695, %v461_v13  ;;  %v238_v18 = vsel %vm237_vm3, %v2276_v14, 0.0 }
 0x35b   :  { %239 = vadd.xlane.f32.xlu0 %v238_v18  ;;  %v2091_v19 = vpop.f32.mrf.mxu1 }
 0x35c   :  { %2279 = vpow2.f32 %v462_v17 }
 0x35d   :  { %v562_v20 = vpop.f32.mrf.mxu1 }
 0x35e   :  { %v568_v21 = vmul.f32 0.25, %v562_v20 }
 0x35f   :  { %v2102_v22 = vpop.f32.mrf.mxu1 }
 0x360   :  { %v569_v23 = vadd.f32 %v568_v21, %v2544_v9 }
 0x361   :  { %v2278_v24 = vpop.eup %2277  ;;  %v565_v25 = vpop.f32.mrf.mxu1 }
 0x362   :  { %v570_v26 = vmul.f32 1.442695, %v569_v23  ;;  %v347_v27 = vsel %vm237_vm3, %v2278_v24, 0.0  ;;  %v1911_v23 = vld [vmem:[%s2844_s7] ss:$0 sm:$0xff] }
 0x363   :  { %348 = vadd.xlane.f32.xlu1 %v347_v27  ;;  %v2103_v28 = vpop.f32.mrf.mxu1 }
 0x364   :  { %2281 = vpow2.f32 %v570_v26 }
 0x369   :  { %v2280_v29 = vpop.eup %2279 }
 0x36a   :  { %v464_v30 = vsel %vm237_vm3, %v2280_v29, 0.0 }
 0x36b   :  { %465 = vadd.xlane.f32.xlu0 %v464_v30 }
 0x371   :  { %v2282_v33 = vpop.eup %2281 }
 0x372   :  { %v572_v34 = vsel %vm237_vm3, %v2282_v33, 0.0 }
 0x373   :  { %573 = vadd.xlane.f32.xlu0 %v572_v34 }
 0x374   :  { %353 = vrot.lane.b32.xlu1 %v2499_v38, %s2358_s1 }
 0x378   :  { %470 = vrot.lane.b32.xlu1 %v2505_v42, %s2359_s20 }
 0x37c   :  { %578 = vrot.lane.b32.xlu1 %v2505_v42, %s2358_s1 }
 0x389   :  { %244 = vrot.lane.b32.xlu0 %v2499_v38, %s2359_s20 }
 0x3e4   :  { %v240_v35 = vpop.xlane.xlu0 %239 }
 0x3e5   :  { %2283 = vrcp.f32 %v240_v35 }
 0x3ec   :  { %v349_v36 = vpop.xlane.xlu1 %348 }
 0x3ed   :  { %2285 = vrcp.f32 %v349_v36 }
 0x3f0   :  { %v354_v45 = vpop.permute.xlu1 %353 }
 0x3f1   :  { %v359_v38 = vsel %vm249_vm4, %v354_v45, 0 }
 0x3f2   :  { %v2284_v39 = vpop.eup %2283 }
 0x3f3   :  { %v242_v41 = vmul.f32 %v2284_v39, %v2276_v14 }
 0x3f4   :  { %v466_v37 = vpop.xlane.xlu0 %465  ;;  %v471_v48 = vpop.permute.xlu1 %470 }
 0x3f5   :  { %2287 = vrcp.f32 %v466_v37  ;;  %v243_v46 = vpack.c.bf16 %v242_v41, %v242_v41  ;;  %v476_v51 = vsel %vm249_vm4, %v471_v48, 0 }
 0x3f8   :  { %v579_v53 = vpop.permute.xlu1 %578 }
 0x3f9   :  { %v584_v56 = vsel %vm249_vm4, %v579_v53, 0 }
 0x3fa   :  { %v2286_v42 = vpop.eup %2285 }
 0x3fb   :  { %v351_v47 = vmul.f32 %v2286_v42, %v2278_v24  ;;  %v2254_v42 = vld [vmem:[%s2847_s10] sm:$0xff]  }
 0x3fc   :  { %v574_v40 = vpop.xlane.xlu0 %573 }
 0x3fd   :  { %2289 = vrcp.f32 %v574_v40  ;;  %v352_v49 = vpack.c.bf16 %v351_v47, %v351_v47 }
 0x400   :  { %v245_v43 = vpop.permute.xlu0 %244 }
 0x401   :  { %v251_v44 = vsel %vm249_vm4, %v245_v43, 0 }
 0x402   :  { %2069 = vmatpush3.bf16.msra.mxu0 %v251_v44  ;;  %v2288_v50 = vpop.eup %2287 }
 0x403   :  { %2080 = vmatprep.subr.bf16.mxu0 %v2353_v15  ;;  %v468_v52 = vmul.f32 %v2288_v50, %v2280_v29 }
 0x405   :  { %2071 = vmatmul.mubr.msk.bf16.vlgmr.msra.gmra.mxu0 %vm237_vm3, %v243_v46  ;;  %v469_v54 = vpack.c.bf16 %v468_v52, %v468_v52 }
 0x406   :  { %2081 = vmatpush3.bf16.msra.mxu0 %v359_v38  ;;  %2082 = vmatprep.mubr.msk.bf16.mxu0 %vm2354_vm1, %v2353_v15 }
 0x407   :  { %2092 = vmatprep.subr.bf16.mxu0 %v2353_v15 }
 0x40a   :  { %v2290_v55 = vpop.eup %2289 }
 0x40b   :  { %v576_v58 = vmul.f32 %v2290_v55, %v2282_v33 }
 0x40d   :  { %2083 = vmatmul.mubr.msk.bf16.vlgmr.msra.gmra.mxu0 %vm237_vm3, %v352_v49  ;;  %v577_v59 = vpack.c.bf16 %v576_v58, %v576_v58 }
 0x40e   :  { %2093 = vmatpush3.bf16.msra.mxu0 %v476_v51  ;;  %2094 = vmatprep.mubr.msk.bf16.mxu0 %vm2354_vm1, %v2353_v15 }
 0x40f   :  { %2104 = vmatprep.subr.bf16.mxu0 %v2353_v15 }
 0x415   :  { %2095 = vmatmul.mubr.msk.bf16.vlgmr.msra.gmra.mxu0 %vm237_vm3, %v469_v54  ;;  %v1915_v54 = vld [vmem:[%s2845_s8] ss:$0 sm:$0xff] }
 0x416   :  { %2105 = vmatpush3.bf16.msra.mxu0 %v584_v56  ;;  %2106 = vmatprep.mubr.msk.bf16.mxu0 %vm2354_vm1, %v2353_v15 }
 0x417   :  { %2118 = vmatprep.subr.bf16.mxu0 %v2353_v15 }
 0x41d   :  { %2107 = vmatmul.mubr.msk.bf16.vlgmr.msra.gmra.mxu0 %vm237_vm3, %v577_v59  ;;  %v1916_v59 = vld [vmem:[%s2846_s9] ss:$0 sm:$0xff] }
 0x41e   :  { %2122 = vmatprep.mubr.msk.bf16.mxu0 %vm2354_vm1, %v2353_v15 }
 0x4c5   :  { %v287_v61 = vpop.f32.mrf.mxu0 }
 0x4c7   :  { %v2072_v62 = vpop.f32.mrf.mxu0 }
 0x4c9   :  { %v290_v63 = vpop.f32.mrf.mxu0 }
 0x4cb   :  { %v2073_v0 = vpop.f32.mrf.mxu0 }
 0x4cc   :  { %v2255_v0 = vld [vmem:[%s2849_s12 + $0x18] sm:$0xff]  }
 0x4cd   :  { %v395_v1 = vpop.f32.mrf.mxu0 }
 0x4cf   :  { %v2084_v2 = vpop.f32.mrf.mxu0 }
 0x4d0   :  { %v2257_v2 = vld [vmem:[%s2849_s12 + $0x8] sm:$0xff]  }
 0x4d1   :  { %v398_v3 = vpop.f32.mrf.mxu0 }
 0x4d2   :  { %v2258_v3 = vld [vmem:[%s2849_s12] sm:$0xff]  }
 0x4d3   :  { %v2085_v4 = vpop.f32.mrf.mxu0 }
 0x4d4   :  { %v1917_v4 = vld [vmem:[%s2848_s11] ss:$0 sm:$0xff] }
 0x4d5   :  { %v512_v6 = vpop.f32.mrf.mxu0 }
 0x4d7   :  { %v2096_v7 = vpop.f32.mrf.mxu0 }
 0x4d9   :  { %v515_v8 = vpop.f32.mrf.mxu0 }
 0x4db   :  { %v2097_v10 = vpop.f32.mrf.mxu0 }
 0x4dd   :  { %v620_v11 = vpop.f32.mrf.mxu0 }
 0x4de   :  { %v2239_v12 = vpack.i.bf16 %v620_v11, %v395_v1  ;;  %v2256_v1 = vld [vmem:[%s2849_s12 + $0x10] sm:$0xff]  }
 0x4df   :  { %v2108_v13 = vpop.f32.mrf.mxu0 }
 0x4e0   :  { %2240 = vrot.lane.b32.xlu0 %v2239_v12, %s2360_s24 }
 0x4e1   :  { %v623_v14 = vpop.f32.mrf.mxu0 }
 0x4e3   :  { %v2109_v16 = vpop.f32.mrf.mxu0 }
 0x552   :  { %v2241_v17 = vpop.permute.xlu0 %2240 }
 0x553   :  { %v2243_v18 = vunpack.i.h.bf16 %v2241_v17  ;;  %v2242_v19 = vunpack.i.l.bf16 %v2241_v17 }
 0x555   :  { %v630_v20 = vsel %vm182_vm2, %v512_v6, %v2243_v18  ;;  %v405_v21 = vsel %vm182_vm2, %v287_v61, %v2242_v19 }
 0x556   :  { %v635_v22 = vpack.c.bf16 %v630_v20, %v405_v21 }
 0x558   :  { %2115 = vmatmul.mubr.msk.bf16.vlgmr.msra.gmra.mxu1 %vm65_vm0, %v635_v22 }
 0x559   :  { %2134 = vmatprep.mubr.msk.bf16.mxu1 %vm2354_vm1, %v2353_v15  ;;  %2127 = vmatpush3.bf16.msra.mxu1 %v2255_v0 }
 0x55a   :  { %2128 = vmatprep.subr.bf16.mxu1 %v2353_v15 }
 0x55d   :  { %2129 = vmatpush3.bf16.msra.mxu1 %v2256_v1  ;;  %v1934_v1 = vld [vmem:[%s2842_s5 + $0x1] ss:$0 sm:$0xff] }
 0x55e   :  { %2130 = vmatprep.subr.bf16.mxu1 %v2353_v15 }
 0x561   :  { %2131 = vmatpush3.bf16.msra.mxu1 %v2257_v2 }
 0x562   :  { %2132 = vmatprep.subr.bf16.mxu1 %v2353_v15 }
 0x565   :  { %2133 = vmatpush3.bf16.msra.mxu1 %v2258_v3 }
 0x566   :  { %2152 = vmatprep.subr.bf16.mxu1 %v2353_v15 }
 0x618   :  { %v692_v24 = vpop.f32.mrf.mxu1 }
 0x619   :  { %v693_v25 = vadd.f32 %v1911_v23, %v692_v24  ;;  %v1921_v24 = vld [vmem:[%s2850_s13] ss:$0 sm:$0xff] }
 0x61a   :  { %v2116_v26 = vpop.f32.mrf.mxu1 }
 0x61b   :  { %v699_v27 = vadd.f32 %v693_v25, %v2487_v31 }
 0x61c   :  { %v695_v28 = vpop.f32.mrf.mxu1 }
 0x61d   :  { %v696_v29 = vadd.f32 %v1911_v23, %v695_v28  ;;  %v703_v30 = vsel %vm65_vm0, %v699_v27, 0.0 }
 0x61e   :  { %704 = vadd.xlane.f32.xlu1 %v703_v30  ;;  %v2117_v33 = vpop.f32.mrf.mxu1 }
 0x61f   :  { %v700_v34 = vadd.f32 %v696_v29, %v2489_v32  ;;  %v2253_v32 = vld [vmem:[%s2847_s10 + $0x8] sm:$0xff]  }
 0x620   :  { %2119 = vmatpush3.bf16.msra.mxu0 %v2253_v32 }
 0x621   :  { %v706_v35 = vsel %vm65_vm0, %v700_v34, 0.0  ;;  %2120 = vmatprep.subr.bf16.mxu0 %v2353_v15 }
 0x622   :  { %707 = vadd.xlane.f32.xlu0 %v706_v35 }
 0x624   :  { %2121 = vmatpush3.bf16.msra.mxu0 %v2254_v42  ;;  %v2259_v42 = vld [vmem:[%s2841_s4 + $0x18] sm:$0xff]  }
 0x625   :  { %2138 = vmatprep.subr.bf16.mxu0 %v2353_v15 }
 0x6a7   :  { %v705_v36 = vpop.xlane.xlu1 %704 }
 0x6a8   :  { %v709_v37 = vmul.f32 0.03125, %v705_v36 }
 0x6aa   :  { %v711_v39 = vsub.f32 %v699_v27, %v709_v37 }
 0x6ab   :  { %v708_v40 = vpop.xlane.xlu0 %707 }
 0x6ac   :  { %v710_v41 = vmul.f32 0.03125, %v708_v40  ;;  %v713_v43 = vmul.f32 %v711_v39, %v711_v39 }
 0x6ae   :  { %v712_v44 = vsub.f32 %v700_v34, %v710_v41  ;;  %v715_v31 = vsel %vm65_vm0, %v713_v43, 0.0 }
 0x6af   :  { %716 = vadd.xlane.f32.xlu0 %v715_v31 }
 0x6b0   :  { %v714_v45 = vmul.f32 %v712_v44, %v712_v44 }
 0x6b2   :  { %v718_v46 = vsel %vm65_vm0, %v714_v45, 0.0 }
 0x6b3   :  { %719 = vadd.xlane.f32.xlu0 %v718_v46 }
 0x738   :  { %v717_v38 = vpop.xlane.xlu0 %716 }
 0x739   :  { %v721_v47 = vmul.f32 0.03125, %v717_v38  ;;  %v2260_v38 = vld [vmem:[%s2841_s4 + $0x10] sm:$0xff]  }
 0x73b   :  { %v723_v48 = vadd.f32 1e-12, %v721_v47 }
 0x73c   :  { %v720_v49 = vpop.xlane.xlu0 %719 }
 0x73d   :  { %2291 = vrsqrt.f32 %v723_v48  ;;  %v722_v50 = vmul.f32 0.03125, %v720_v49 }
 0x73f   :  { %v724_v51 = vadd.f32 1e-12, %v722_v50 }
 0x741   :  { %2293 = vrsqrt.f32 %v724_v51 }
 0x74a   :  { %v2292_v52 = vpop.eup %2291 }
 0x74b   :  { %v727_v53 = vmul.f32 %v2292_v52, %v711_v39 }
 0x74d   :  { %v735_v58 = vmul.f32 %v1915_v54, %v727_v53 }
 0x74e   :  { %v2294_v55 = vpop.eup %2293 }
 0x74f   :  { %v728_v56 = vmul.f32 %v2294_v55, %v712_v44  ;;  %v743_v61 = vadd.f32 %v1916_v59, %v735_v58  ;;  %v1927_v55 = vld [vmem:[%s2851_s14] ss:$0 sm:$0xff] }
 0x751   :  { %v736_v60 = vmul.f32 %v1915_v54, %v728_v56 }
 0x753   :  { %v744_v62 = vadd.f32 %v1916_v59, %v736_v60  ;;  %v1928_v60 = vld [vmem:[%s2852_s15] ss:$0 sm:$0xff] }
 0x755   :  { %v749_v63 = vpack.c.bf16 %v744_v62, %v743_v61 }
 0x757   :  { %2123 = vmatmul.mubr.msk.bf16.vlgmr.msra.gmra.mxu0 %vm65_vm0, %v749_v63 }
 0x758   :  { %2142 = vmatprep.mubr.msk.bf16.mxu0 %vm2354_vm1, %v2353_v15  ;;  %2139 = vmatpush3.bf16.msra.mxu0 %v2259_v42 }
 0x759   :  { %2140 = vmatprep.subr.bf16.mxu0 %v2353_v15 }
 0x75c   :  { %2141 = vmatpush3.bf16.msra.mxu0 %v2260_v38 }
 0x75d   :  { %2146 = vmatprep.subr.bf16.mxu0 %v2353_v15 }
 0x817   :  { %v806_v5 = vpop.f32.mrf.mxu0 }
 0x818   :  { %v807_v6 = vadd.f32 %v1917_v4, %v806_v5 }
 0x819   :  { %v2124_v7 = vpop.f32.mrf.mxu0 }
 0x81a   :  { %v815_v8 = vmul.f32 0.70710677, %v807_v6  ;;  %v813_v18 = vmul.f32 0.5, %v807_v6 }
 0x81b   :  { %v809_v10 = vpop.f32.mrf.mxu0 }
 0x81c   :  { %2295 = verf.f32 %v815_v8  ;;  %v810_v11 = vadd.f32 %v1917_v4, %v809_v10 }
 0x81d   :  { %v2125_v12 = vpop.f32.mrf.mxu0 }
 0x81e   :  { %v816_v13 = vmul.f32 0.70710677, %v810_v11  ;;  %v814_v19 = vmul.f32 0.5, %v810_v11 }
 0x820   :  { %2297 = verf.f32 %v816_v13 }
 0x829   :  { %v2296_v14 = vpop.eup %2295 }
 0x82a   :  { %v819_v16 = vadd.f32 1.0, %v2296_v14 }
 0x82c   :  { %v821_v21 = vmul.f32 %v819_v16, %v813_v18 }
 0x82d   :  { %v2298_v17 = vpop.eup %2297 }
 0x82e   :  { %v820_v20 = vadd.f32 1.0, %v2298_v17 }
 0x830   :  { %v822_v22 = vmul.f32 %v820_v20, %v814_v19 }
 0x832   :  { %v831_v23 = vpack.c.bf16 %v822_v22, %v821_v21 }
 0x834   :  { %2135 = vmatmul.mubr.msk.bf16.vlgmr.msra.gmra.mxu1 %vm863_vm5, %v831_v23 }
 0x835   :  { %2154 = vmatprep.mubr.msk.bf16.mxu1 %vm2354_vm1, %v2353_v15 }
 0x8f4   :  { %v901_v25 = vpop.f32.mrf.mxu1 }
 0x8f5   :  { %v902_v26 = vadd.f32 %v1921_v24, %v901_v25 }
 0x8f6   :  { %v2136_v27 = vpop.f32.mrf.mxu1 }
 0x8f7   :  { %v908_v28 = vadd.f32 %v902_v26, %v743_v61 }
 0x8f8   :  { %v904_v29 = vpop.f32.mrf.mxu1 }
 0x8f9   :  { %v905_v30 = vadd.f32 %v1921_v24, %v904_v29  ;;  %v912_v33 = vsel %vm65_vm0, %v908_v28, 0.0 }
 0x8fa   :  { %913 = vadd.xlane.f32.xlu1 %v912_v33  ;;  %v2137_v34 = vpop.f32.mrf.mxu1 }
 0x8fb   :  { %v909_v35 = vadd.f32 %v905_v30, %v744_v62 }
 0x8fd   :  { %v915_v36 = vsel %vm65_vm0, %v909_v35, 0.0 }
 0x8fe   :  { %916 = vadd.xlane.f32.xlu0 %v915_v36 }
 0x983   :  { %v914_v37 = vpop.xlane.xlu1 %913 }
 0x984   :  { %v918_v39 = vmul.f32 0.03125, %v914_v37 }
 0x986   :  { %v920_v40 = vsub.f32 %v908_v28, %v918_v39 }
 0x987   :  { %v917_v41 = vpop.xlane.xlu0 %916 }
 0x988   :  { %v919_v43 = vmul.f32 0.03125, %v917_v41  ;;  %v922_v44 = vmul.f32 %v920_v40, %v920_v40 }
 0x98a   :  { %v921_v31 = vsub.f32 %v909_v35, %v919_v43  ;;  %v924_v45 = vsel %vm65_vm0, %v922_v44, 0.0 }
 0x98b   :  { %925 = vadd.xlane.f32.xlu1 %v924_v45 }
 0x98c   :  { %v923_v46 = vmul.f32 %v921_v31, %v921_v31 }
 0x98e   :  { %v927_v32 = vsel %vm65_vm0, %v923_v46, 0.0 }
 0x98f   :  { %928 = vadd.xlane.f32.xlu0 %v927_v32 }
 0xa14   :  { %v926_v47 = vpop.xlane.xlu1 %925 }
 0xa15   :  { %v930_v48 = vmul.f32 0.03125, %v926_v47 }
 0xa17   :  { %v932_v49 = vadd.f32 1e-12, %v930_v48 }
 0xa18   :  { %v929_v50 = vpop.xlane.xlu0 %928 }
 0xa19   :  { %2299 = vrsqrt.f32 %v932_v49  ;;  %v931_v51 = vmul.f32 0.03125, %v929_v50 }
 0xa1b   :  { %v933_v52 = vadd.f32 1e-12, %v931_v51 }
 0xa1d   :  { %2301 = vrsqrt.f32 %v933_v52 }
 0xa26   :  { %v2300_v53 = vpop.eup %2299 }
 0xa27   :  { %v936_v54 = vmul.f32 %v2300_v53, %v920_v40 }
 0xa29   :  { %v944_v59 = vmul.f32 %v1927_v55, %v936_v54 }
 0xa2a   :  { %v2302_v56 = vpop.eup %2301 }
 0xa2b   :  { %v937_v58 = vmul.f32 %v2302_v56, %v921_v31  ;;  %v2663_v62 = vadd.f32 %v1928_v60, %v944_v59 }
 0xa2d   :  { %v945_v61 = vmul.f32 %v1927_v55, %v937_v58 }
 0xa2f   :  { %v2665_v63 = vadd.f32 %v1928_v60, %v945_v61 }
 0xa31   :  { %v959_v0 = vpack.c.bf16 %v2665_v63, %v2663_v62 }
 0xa33   :  { %2143 = vmatmul.mubr.msk.bf16.vlgmr.msra.gmra.mxu0 %vm65_vm0, %v959_v0 }
 0xa34   :  { %2148 = vmatprep.mubr.msk.bf16.mxu0 %vm2354_vm1, %v2353_v15 }
 0xaf3   :  { %v1017_v2 = vpop.f32.mrf.mxu0 }
 0xaf4   :  { %v1018_v3 = vadd.f32 %v1934_v1, %v1017_v2 }
 0xaf5   :  { %v2144_v4 = vpop.f32.mrf.mxu0 }
 0xaf6   :  { %v2675_v5 = vpack.c.bf16 %v1018_v3, %v1018_v3 }
 0xaf7   :  { %v1020_v6 = vpop.f32.mrf.mxu0 }
 0xaf8   :  { %v1021_v7 = vadd.f32 %v1934_v1, %v1020_v6  ;;  %1134 = vrot.lane.b32.xlu0 %v2675_v5, %s2355_s3  ;;  %1026 = vrot.lane.b32.xlu1 %v2675_v5, %s2356_s28 }
 0xaf9   :  { %v2145_v8 = vpop.f32.mrf.mxu0 }
 0xafa   :  { %v2681_v10 = vpack.c.bf16 %v1021_v7, %v1021_v7 }
 0xafc   :  { %1132 = vrot.lane.b32.xlu1 %v2675_v5, %s2357_s29  ;;  %1353 = vrot.lane.b32.xlu0 %v2681_v10, %s2357_s29 }
 0xb00   :  { %1247 = vrot.lane.b32.xlu1 %v2681_v10, %s2356_s28 }
 0xb04   :  { %1355 = vrot.lane.b32.xlu1 %v2681_v10, %s2355_s3 }
 0xb6a   :  { %v1027_v11 = vpop.permute.xlu1 %1026  ;;  %v1135_v13 = vpop.permute.xlu0 %1134 }
 0xb6b   :  { %v1032_v12 = vsel %vm182_vm2, %v1027_v11, 0  ;;  %v1140_v16 = vsel %vm182_vm2, %v1135_v13, 0 }
 0xb6c   :  { %2147 = vmatpush3.bf16.xpose.msra.mxu0 %v1032_v12 }
 0xb6d   :  { %2158 = vmatprep.subr.bf16.mxu0 %v2353_v15 }
 0xb6e   :  { %v1133_v14 = vpop.permute.xlu1 %1132  ;;  %v1354_v21 = vpop.permute.xlu0 %1353 }
 0xb72   :  { %v1248_v17 = vpop.permute.xlu1 %1247 }
 0xb73   :  { %2149 = vmatmul.mubr.msk.bf16.vlgmr.msra.gmra.mxu0 %vm182_vm2, %v2675_v5  ;;  %v1253_v18 = vsel %vm182_vm2, %v1248_v17, 0 }
 0xb74   :  { %2159 = vmatpush3.bf16.xpose.msra.mxu0 %v1140_v16  ;;  %2160 = vmatprep.mubr.msk.bf16.mxu0 %vm2354_vm1, %v2353_v15 }
 0xb75   :  { %2170 = vmatprep.subr.bf16.mxu0 %v2353_v15 }
 0xb76   :  { %v1356_v19 = vpop.permute.xlu1 %1355 }
 0xb77   :  { %v1361_v20 = vsel %vm182_vm2, %v1356_v19, 0 }
 0xb7b   :  { %2161 = vmatmul.mubr.msk.bf16.vlgmr.msra.gmra.mxu0 %vm182_vm2, %v1133_v14 }
 0xb7c   :  { %2171 = vmatpush3.bf16.xpose.msra.mxu0 %v1253_v18  ;;  %2172 = vmatprep.mubr.msk.bf16.mxu0 %vm2354_vm1, %v2353_v15 }
 0xb7d   :  { %2182 = vmatprep.subr.bf16.mxu0 %v2353_v15 }
 0xb83   :  { %2173 = vmatmul.mubr.msk.bf16.vlgmr.msra.gmra.mxu0 %vm182_vm2, %v2681_v10 }
 0xb84   :  { %2183 = vmatpush3.bf16.xpose.msra.mxu0 %v1361_v20  ;;  %2184 = vmatprep.mubr.msk.bf16.mxu0 %vm2354_vm1, %v2353_v15 }
 0xb85   :  { %2194 = vmatprep.subr.bf16.mxu0 %v2353_v15 }
 0xb8b   :  { %2185 = vmatmul.mubr.msk.bf16.vlgmr.msra.gmra.mxu0 %vm182_vm2, %v1354_v21  ;;  %v2261_v21 = vld [vmem:[%s2843_s6 + $0x18] sm:$0xff]  }
 0xb8c   :  { %2198 = vmatprep.mubr.msk.bf16.mxu0 %vm2354_vm1, %v2353_v15  ;;  %2195 = vmatpush3.bf16.msra.mxu0 %v2261_v21 }
 0xb8d   :  { %2196 = vmatprep.subr.bf16.mxu0 %v2353_v15 }
 0xc33   :  { %v1068_v22 = vpop.f32.mrf.mxu0 }
 0xc34   :  { %v1074_v23 = vmul.f32 0.25, %v1068_v22 }
 0xc35   :  { %v2150_v24 = vpop.f32.mrf.mxu0 }
 0xc36   :  { %v1075_v25 = vadd.f32 %v1074_v23, %v2540_v57 }
 0xc37   :  { %v1071_v26 = vpop.f32.mrf.mxu0 }
 0xc38   :  { %v1076_v27 = vmul.f32 1.442695, %v1075_v25 }
 0xc39   :  { %v2151_v28 = vpop.f32.mrf.mxu0 }
 0xc3a   :  { %2303 = vpow2.f32 %v1076_v27 }
 0xc3b   :  { %v1176_v29 = vpop.f32.mrf.mxu0 }
 0xc3c   :  { %v1182_v30 = vmul.f32 0.25, %v1176_v29 }
 0xc3d   :  { %v2162_v33 = vpop.f32.mrf.mxu0 }
 0xc3e   :  { %v1183_v34 = vadd.f32 %v1182_v30, %v2540_v57  ;;  %v2262_v30 = vld [vmem:[%s2843_s6 + $0x10] sm:$0xff]  }
 0xc3f   :  { %v1179_v35 = vpop.f32.mrf.mxu0  ;;  %2197 = vmatpush3.bf16.msra.mxu0 %v2262_v30 }
 0xc40   :  { %v1184_v36 = vmul.f32 1.442695, %v1183_v34  ;;  %2210 = vmatprep.subr.bf16.mxu0 %v2353_v15 }
 0xc41   :  { %v2163_v37 = vpop.f32.mrf.mxu0 }
 0xc42   :  { %2305 = vpow2.f32 %v1184_v36 }
 0xc43   :  { %v1289_v39 = vpop.f32.mrf.mxu0 }
 0xc44   :  { %v1295_v40 = vmul.f32 0.25, %v1289_v39 }
 0xc45   :  { %v2174_v41 = vpop.f32.mrf.mxu0 }
 0xc46   :  { %v1296_v43 = vadd.f32 %v1295_v40, %v2544_v9 }
 0xc47   :  { %v2304_v44 = vpop.eup %2303  ;;  %v1292_v31 = vpop.f32.mrf.mxu0 }
 0xc48   :  { %v1297_v45 = vmul.f32 1.442695, %v1296_v43  ;;  %v1078_v46 = vsel %vm237_vm3, %v2304_v44, 0.0 }
 0xc49   :  { %1079 = vadd.xlane.f32.xlu1 %v1078_v46  ;;  %v2175_v32 = vpop.f32.mrf.mxu0 }
 0xc4a   :  { %2307 = vpow2.f32 %v1297_v45 }
 0xc4b   :  { %v1397_v42 = vpop.f32.mrf.mxu0 }
 0xc4c   :  { %v1403_v38 = vmul.f32 0.25, %v1397_v42 }
 0xc4d   :  { %v2186_v57 = vpop.f32.mrf.mxu0 }
 0xc4e   :  { %v1404_v47 = vadd.f32 %v1403_v38, %v2544_v9  ;;  %v1951_v38 = vld [vmem:[%s2844_s7 + $0x1] ss:$0 sm:$0xff] }
 0xc4f   :  { %v2306_v48 = vpop.eup %2305  ;;  %v1400_v49 = vpop.f32.mrf.mxu0 }
 0xc50   :  { %v1405_v50 = vmul.f32 1.442695, %v1404_v47  ;;  %v1186_v51 = vsel %vm237_vm3, %v2306_v48, 0.0 }
 0xc51   :  { %1187 = vadd.xlane.f32.xlu0 %v1186_v51  ;;  %v2187_v52 = vpop.f32.mrf.mxu0 }
 0xc52   :  { %2309 = vpow2.f32 %v1405_v50 }
 0xc57   :  { %v2308_v53 = vpop.eup %2307 }
 0xc58   :  { %v1299_v54 = vsel %vm237_vm3, %v2308_v53, 0.0 }
 0xc59   :  { %1300 = vadd.xlane.f32.xlu0 %v1299_v54 }
 0xc5a   :  { %1084 = vrot.lane.b32.xlu1 %v2675_v5, %s2359_s20 }
 0xc5e   :  { %1305 = vrot.lane.b32.xlu1 %v2681_v10, %s2359_s20 }
 0xc5f   :  { %v2310_v55 = vpop.eup %2309 }
 0xc60   :  { %v1407_v9 = vsel %vm237_vm3, %v2310_v55, 0.0 }
 0xc61   :  { %1408 = vadd.xlane.f32.xlu0 %v1407_v9 }
 0xc62   :  { %1413 = vrot.lane.b32.xlu1 %v2681_v10, %s2358_s1 }
 0xc77   :  { %1192 = vrot.lane.b32.xlu0 %v2675_v5, %s2358_s1 }
 0xcd2   :  { %v1080_v56 = vpop.xlane.xlu1 %1079 }
 0xcd3   :  { %2311 = vrcp.f32 %v1080_v56 }
 0xcd6   :  { %v1085_v58 = vpop.permute.xlu1 %1084 }
 0xcd7   :  { %v1090_v59 = vsel %vm249_vm4, %v1085_v58, 0 }
 0xcd8   :  { %2153 = vmatpush3.bf16.msra.mxu1 %v1090_v59 }
 0xcd9   :  { %2164 = vmatprep.subr.bf16.mxu1 %v2353_v15 }
 0xcda   :  { %v1188_v60 = vpop.xlane.xlu0 %1187  ;;  %v1306_v8 = vpop.permute.xlu1 %1305 }
 0xcdb   :  { %2313 = vrcp.f32 %v1188_v60  ;;  %v1311_v12 = vsel %vm249_vm4, %v1306_v8, 0 }
 0xcde   :  { %v1414_v14 = vpop.permute.xlu1 %1413 }
 0xcdf   :  { %v1419_v18 = vsel %vm249_vm4, %v1414_v14, 0 }
 0xce0   :  { %v2312_v61 = vpop.eup %2311 }
 0xce1   :  { %v1082_v0 = vmul.f32 %v2312_v61, %v2304_v44 }
 0xce2   :  { %v1301_v1 = vpop.xlane.xlu0 %1300 }
 0xce3   :  { %v1083_v2 = vpack.c.bf16 %v1082_v0, %v1082_v0  ;;  %2315 = vrcp.f32 %v1301_v1 }
 0xce5   :  { %2155 = vmatmul.mubr.msk.bf16.vlgmr.msra.gmra.mxu1 %vm237_vm3, %v1083_v2 }
 0xce6   :  { %2166 = vmatprep.mubr.msk.bf16.mxu1 %vm2354_vm1, %v2353_v15 }
 0xce8   :  { %v2314_v3 = vpop.eup %2313 }
 0xce9   :  { %v1190_v5 = vmul.f32 %v2314_v3, %v2306_v48  ;;  %v2264_v3 = vld [vmem:[%s2847_s10 + $0x10] sm:$0xff]  }
 0xcea   :  { %v1409_v4 = vpop.xlane.xlu0 %1408 }
 0xceb   :  { %2317 = vrcp.f32 %v1409_v4  ;;  %v1191_v10 = vpack.c.bf16 %v1190_v5, %v1190_v5 }
 0xcee   :  { %v1193_v6 = vpop.permute.xlu0 %1192 }
 0xcef   :  { %v1198_v7 = vsel %vm249_vm4, %v1193_v6, 0 }
 0xcf0   :  { %2165 = vmatpush3.bf16.msra.mxu1 %v1198_v7  ;;  %v2316_v11 = vpop.eup %2315 }
 0xcf1   :  { %2176 = vmatprep.subr.bf16.mxu1 %v2353_v15  ;;  %v1303_v13 = vmul.f32 %v2316_v11, %v2308_v53 }
 0xcf3   :  { %2167 = vmatmul.mubr.msk.bf16.vlgmr.msra.gmra.mxu1 %vm237_vm3, %v1191_v10  ;;  %v1304_v16 = vpack.c.bf16 %v1303_v13, %v1303_v13  ;;  %v1957_v13 = vld [vmem:[%s2845_s8 + $0x1] ss:$0 sm:$0xff] }
 0xcf4   :  { %2177 = vmatpush3.bf16.msra.mxu1 %v1311_v12  ;;  %2178 = vmatprep.mubr.msk.bf16.mxu1 %vm2354_vm1, %v2353_v15 }
 0xcf5   :  { %2188 = vmatprep.subr.bf16.mxu1 %v2353_v15 }
 0xcf8   :  { %v2318_v17 = vpop.eup %2317 }
 0xcf9   :  { %v1411_v19 = vmul.f32 %v2318_v17, %v2310_v55 }
 0xcfb   :  { %2179 = vmatmul.mubr.msk.bf16.vlgmr.msra.gmra.mxu1 %vm237_vm3, %v1304_v16  ;;  %v1412_v20 = vpack.c.bf16 %v1411_v19, %v1411_v19 }
 0xcfc   :  { %2189 = vmatpush3.bf16.msra.mxu1 %v1419_v18  ;;  %2190 = vmatprep.mubr.msk.bf16.mxu1 %vm2354_vm1, %v2353_v15  ;;  %v1958_v18 = vld [vmem:[%s2846_s9 + $0x1] ss:$0 sm:$0xff] }
 0xcfd   :  { %2202 = vmatprep.subr.bf16.mxu1 %v2353_v15 }
 0xd03   :  { %2191 = vmatmul.mubr.msk.bf16.vlgmr.msra.gmra.mxu1 %vm237_vm3, %v1412_v20 }
 0xd04   :  { %2206 = vmatprep.mubr.msk.bf16.mxu1 %vm2354_vm1, %v2353_v15 }
 0xda5   :  { %v1126_v22 = vpop.f32.mrf.mxu1 }
 0xda7   :  { %v2156_v23 = vpop.f32.mrf.mxu1 }
 0xda8   :  { %v2265_v23 = vld [vmem:[%s2849_s12 + $0x38] sm:$0xff]  }
 0xda9   :  { %v1129_v24 = vpop.f32.mrf.mxu1 }
 0xdaa   :  { %v2266_v24 = vld [vmem:[%s2849_s12 + $0x30] sm:$0xff]  }
 0xdab   :  { %v2157_v25 = vpop.f32.mrf.mxu1 }
 0xdac   :  { %v2267_v25 = vld [vmem:[%s2849_s12 + $0x28] sm:$0xff]  }
 0xdb3   :  { %v1234_v26 = vpop.f32.mrf.mxu1 }
 0xdb5   :  { %v2168_v27 = vpop.f32.mrf.mxu1 }
 0xdb6   :  { %v1964_v27 = vld [vmem:[%s2848_s11 + $0x1] ss:$0 sm:$0xff] }
 0xdb7   :  { %v1237_v28 = vpop.f32.mrf.mxu1 }
 0xdb9   :  { %v2169_v29 = vpop.f32.mrf.mxu1 }
 0xdbb   :  { %v1347_v33 = vpop.f32.mrf.mxu1 }
 0xdbd   :  { %v2180_v34 = vpop.f32.mrf.mxu1 }
 0xdbf   :  { %v1350_v35 = vpop.f32.mrf.mxu1 }
 0xdc1   :  { %v2181_v36 = vpop.f32.mrf.mxu1 }
 0xdc3   :  { %v1455_v37 = vpop.f32.mrf.mxu1 }
 0xdc4   :  { %v2244_v39 = vpack.i.bf16 %v1455_v37, %v1234_v26  ;;  %v2268_v26 = vld [vmem:[%s2849_s12 + $0x20] sm:$0xff]  }
 0xdc5   :  { %v2192_v40 = vpop.f32.mrf.mxu1 }
 0xdc6   :  { %2245 = vrot.lane.b32.xlu1 %v2244_v39, %s2360_s24 }
 0xdc7   :  { %v1458_v41 = vpop.f32.mrf.mxu1 }
 0xdc9   :  { %v2193_v43 = vpop.f32.mrf.mxu1 }
 0xe38   :  { %v2246_v44 = vpop.permute.xlu1 %2245 }
 0xe39   :  { %v2248_v31 = vunpack.i.h.bf16 %v2246_v44  ;;  %v2247_v45 = vunpack.i.l.bf16 %v2246_v44 }
 0xe3b   :  { %v1465_v46 = vsel %vm182_vm2, %v1347_v33, %v2248_v31  ;;  %v1244_v32 = vsel %vm182_vm2, %v1126_v22, %v2247_v45 }
 0xe3c   :  { %v1471_v42 = vpack.c.bf16 %v1465_v46, %v1244_v32 }
 0xe3e   :  { %2199 = vmatmul.mubr.msk.bf16.vlgmr.msra.gmra.mxu0 %vm65_vm0, %v1471_v42  ;;  %v1977_v42 = vld [vmem:[%s2850_s13 + $0x1] ss:$0 sm:$0xff] }
 0xe3f   :  { %2218 = vmatprep.mubr.msk.bf16.mxu0 %vm2354_vm1, %v2353_v15  ;;  %2211 = vmatpush3.bf16.msra.mxu0 %v2265_v23 }
 0xe40   :  { %2212 = vmatprep.subr.bf16.mxu0 %v2353_v15 }
 0xe43   :  { %2213 = vmatpush3.bf16.msra.mxu0 %v2266_v24 }
 0xe44   :  { %2214 = vmatprep.subr.bf16.mxu0 %v2353_v15 }
 0xe47   :  { %2215 = vmatpush3.bf16.msra.mxu0 %v2267_v25 }
 0xe48   :  { %2216 = vmatprep.subr.bf16.mxu0 %v2353_v15 }
 0xe4b   :  { %2217 = vmatpush3.bf16.msra.mxu0 %v2268_v26 }
 0xefe   :  { %v1529_v57 = vpop.f32.mrf.mxu0 }
 0xeff   :  { %v1530_v47 = vadd.f32 %v1951_v38, %v1529_v57 }
 0xf00   :  { %v2200_v48 = vpop.f32.mrf.mxu0 }
 0xf01   :  { %v1536_v49 = vadd.f32 %v1530_v47, %v2663_v62 }
 0xf02   :  { %v1532_v50 = vpop.f32.mrf.mxu0 }
 0xf03   :  { %v1533_v51 = vadd.f32 %v1951_v38, %v1532_v50  ;;  %v1542_v52 = vsel %vm65_vm0, %v1536_v49, 0.0 }
 0xf04   :  { %1543 = vadd.xlane.f32.xlu0 %v1542_v52  ;;  %v2201_v53 = vpop.f32.mrf.mxu0 }
 0xf05   :  { %v1537_v54 = vadd.f32 %v1533_v51, %v2665_v63  ;;  %v2263_v63 = vld [vmem:[%s2847_s10 + $0x18] sm:$0xff]  }
 0xf06   :  { %2203 = vmatpush3.bf16.msra.mxu1 %v2263_v63  ;;  %v2270_v63 = vld [vmem:[%s2853_s16] sm:$0xff]  }
 0xf07   :  { %v1545_v55 = vsel %vm65_vm0, %v1537_v54, 0.0  ;;  %2204 = vmatprep.subr.bf16.mxu1 %v2353_v15 }
 0xf08   :  { %1546 = vadd.xlane.f32.xlu1 %v1545_v55 }
 0xf0a   :  { %2205 = vmatpush3.bf16.msra.mxu1 %v2264_v3 }
 0xf0b   :  { %2222 = vmatprep.subr.bf16.mxu1 %v2353_v15 }
 0xf8d   :  { %v1544_v9 = vpop.xlane.xlu0 %1543 }
 0xf8e   :  { %v1548_v56 = vmul.f32 0.03125, %v1544_v9 }
 0xf90   :  { %v1550_v58 = vsub.f32 %v1536_v49, %v1548_v56 }
 0xf91   :  { %v1547_v59 = vpop.xlane.xlu1 %1546 }
 0xf92   :  { %v1549_v60 = vmul.f32 0.03125, %v1547_v59  ;;  %v1552_v61 = vmul.f32 %v1550_v58, %v1550_v58 }
 0xf94   :  { %v1551_v0 = vsub.f32 %v1537_v54, %v1549_v60  ;;  %v1554_v62 = vsel %vm65_vm0, %v1552_v61, 0.0 }
 0xf95   :  { %1555 = vadd.xlane.f32.xlu0 %v1554_v62 }
 0xf96   :  { %v1553_v1 = vmul.f32 %v1551_v0, %v1551_v0 }
 0xf98   :  { %v1557_v2 = vsel %vm65_vm0, %v1553_v1, 0.0 }
 0xf99   :  { %1558 = vadd.xlane.f32.xlu0 %v1557_v2  ;;  %v2269_v2 = vld [vmem:[%s2853_s16 + $0x8] sm:$0xff]   ;;  %s2361_s16 = smov [#allocation2]  }
 0xf9a   :  { %s1889_s24 = sshll.u32 %s2361_s16, 4  ;;  %s1890_s24 = int_to_ptr.vmem [resolvable:$true] %s1889_s24 }
 0xf9b   :  { %s2331_s26 = scalar_lea.vmem %s1890_s24, 32  ;;  %p2336_p1 = scmp.lt.s32.totalorder %s1890_s24, %s1890_s24 }
 0xf9c   :  { %p2332_p0 = scmp.ne.s32.totalorder %s1890_s24, %s2331_s26  ;;  %p2337_p2 = scmp.lt.s32.totalorder %s2331_s26, %s2331_s26 }
 0xf9e   :  { %p2338_p3 = por %p2337_p2, %p2336_p1 }
 0xfa0   :  { %p2339_p4 = pnand %p2338_p3, %p2332_p0 }
0x101e   :  { %v1556_v4 = vpop.xlane.xlu0 %1555 }
0x101f   :  { %v1560_v5 = vmul.f32 0.03125, %v1556_v4 }
0x1021   :  { %v1562_v6 = vadd.f32 1e-12, %v1560_v5 }
0x1022   :  { %v1559_v7 = vpop.xlane.xlu0 %1558 }
0x1023   :  { %2319 = vrsqrt.f32 %v1562_v6  ;;  %v1561_v8 = vmul.f32 0.03125, %v1559_v7 }
0x1025   :  { %v1563_v10 = vadd.f32 1e-12, %v1561_v8 }
0x1027   :  { %2321 = vrsqrt.f32 %v1563_v10 }
0x1030   :  { %v2320_v11 = vpop.eup %2319 }
0x1031   :  { %v1566_v12 = vmul.f32 %v2320_v11, %v1550_v58  ;;  %v1985_v11 = vld [vmem:[%s2851_s14 + $0x1] ss:$0 sm:$0xff] }
0x1033   :  { %v1574_v17 = vmul.f32 %v1957_v13, %v1566_v12 }
0x1034   :  { %v2322_v14 = vpop.eup %2321 }
0x1035   :  { %v1567_v16 = vmul.f32 %v2322_v14, %v1551_v0  ;;  %v1582_v20 = vadd.f32 %v1958_v18, %v1574_v17 }
0x1037   :  { %v1575_v19 = vmul.f32 %v1957_v13, %v1567_v16  ;;  %v1986_v13 = vld [vmem:[%s2852_s15 + $0x1] ss:$0 sm:$0xff] }
0x1039   :  { %v1583_v21 = vadd.f32 %v1958_v18, %v1575_v19 }
0x103b   :  { %v1589_v22 = vpack.c.bf16 %v1583_v21, %v1582_v20 }
0x103d   :  { %2207 = vmatmul.mubr.msk.bf16.vlgmr.msra.gmra.mxu1 %vm65_vm0, %v1589_v22 }
0x103e   :  { %2226 = vmatprep.mubr.msk.bf16.mxu1 %vm2354_vm1, %v2353_v15  ;;  %2223 = vmatpush3.bf16.msra.mxu1 %v2269_v2 }
0x103f   :  { %2224 = vmatprep.subr.bf16.mxu1 %v2353_v15 }
0x1042   :  { %2225 = vmatpush3.bf16.msra.mxu1 %v2270_v63 }
0x10fd   :  { %v1647_v28 = vpop.f32.mrf.mxu1 }
0x10fe   :  { %v1648_v29 = vadd.f32 %v1964_v27, %v1647_v28 }
0x10ff   :  { %v2208_v30 = vpop.f32.mrf.mxu1 }
0x1100   :  { %v1656_v33 = vmul.f32 0.70710677, %v1648_v29  ;;  %v1654_v43 = vmul.f32 0.5, %v1648_v29 }
0x1101   :  { %v1650_v34 = vpop.f32.mrf.mxu1 }
0x1102   :  { %2323 = verf.f32 %v1656_v33  ;;  %v1651_v35 = vadd.f32 %v1964_v27, %v1650_v34 }
0x1103   :  { %v2209_v36 = vpop.f32.mrf.mxu1 }
0x1104   :  { %v1657_v37 = vmul.f32 0.70710677, %v1651_v35  ;;  %v1655_v44 = vmul.f32 0.5, %v1651_v35 }
0x1106   :  { %2325 = verf.f32 %v1657_v37 }
0x110f   :  { %v2324_v39 = vpop.eup %2323 }
0x1110   :  { %v1660_v40 = vadd.f32 1.0, %v2324_v39  ;;  %v1987_v39 = vld [vmem:[%s2854_s17] ss:$0 sm:$0xff] }
0x1112   :  { %v1662_v45 = vmul.f32 %v1660_v40, %v1654_v43 }
0x1113   :  { %v2326_v41 = vpop.eup %2325 }
0x1114   :  { %v1661_v31 = vadd.f32 1.0, %v2326_v41 }
0x1116   :  { %v1663_v46 = vmul.f32 %v1661_v31, %v1655_v44 }
0x1118   :  { %v1673_v32 = vpack.c.bf16 %v1663_v46, %v1662_v45 }
0x111a   :  { %2219 = vmatmul.mubr.msk.bf16.vlgmr.msra.gmra.mxu0 %vm863_vm5, %v1673_v32 }
0x11da   :  { %v1743_v38 = vpop.f32.mrf.mxu0 }
0x11db   :  { %v1744_v57 = vadd.f32 %v1977_v42, %v1743_v38 }
0x11dc   :  { %v2220_v47 = vpop.f32.mrf.mxu0 }
0x11dd   :  { %v1750_v48 = vadd.f32 %v1744_v57, %v1582_v20 }
0x11de   :  { %v1746_v49 = vpop.f32.mrf.mxu0 }
0x11df   :  { %v1747_v50 = vadd.f32 %v1977_v42, %v1746_v49  ;;  %v1756_v51 = vsel %vm65_vm0, %v1750_v48, 0.0 }
0x11e0   :  { %1757 = vadd.xlane.f32.xlu0 %v1756_v51  ;;  %v2221_v52 = vpop.f32.mrf.mxu0 }
0x11e1   :  { %v1751_v53 = vadd.f32 %v1747_v50, %v1583_v21 }
0x11e3   :  { %v1759_v54 = vsel %vm65_vm0, %v1751_v53, 0.0 }
0x11e4   :  { %1760 = vadd.xlane.f32.xlu1 %v1759_v54 }
0x1269   :  { %v1758_v55 = vpop.xlane.xlu0 %1757 }
0x126a   :  { %v1762_v9 = vmul.f32 0.03125, %v1758_v55 }
0x126c   :  { %v1764_v56 = vsub.f32 %v1750_v48, %v1762_v9 }
0x126d   :  { %v1761_v58 = vpop.xlane.xlu1 %1760 }
0x126e   :  { %v1763_v59 = vmul.f32 0.03125, %v1761_v58  ;;  %v1766_v60 = vmul.f32 %v1764_v56, %v1764_v56 }
0x1270   :  { %v1765_v61 = vsub.f32 %v1751_v53, %v1763_v59  ;;  %v1768_v0 = vsel %vm65_vm0, %v1766_v60, 0.0 }
0x1271   :  { %1769 = vadd.xlane.f32.xlu0 %v1768_v0 }
0x1272   :  { %v1767_v62 = vmul.f32 %v1765_v61, %v1765_v61 }
0x1274   :  { %v1771_v1 = vsel %vm65_vm0, %v1767_v62, 0.0 }
0x1275   :  { %1772 = vadd.xlane.f32.xlu1 %v1771_v1 }
0x12fa   :  { %v1770_v3 = vpop.xlane.xlu0 %1769 }
0x12fb   :  { %v1774_v4 = vmul.f32 0.03125, %v1770_v3 }
0x12fd   :  { %v1776_v5 = vadd.f32 1e-12, %v1774_v4 }
0x12fe   :  { %v1773_v6 = vpop.xlane.xlu1 %1772 }
0x12ff   :  { %2327 = vrsqrt.f32 %v1776_v5  ;;  %v1775_v7 = vmul.f32 0.03125, %v1773_v6 }
0x1301   :  { %v1777_v8 = vadd.f32 1e-12, %v1775_v7 }
0x1303   :  { %2329 = vrsqrt.f32 %v1777_v8 }
0x130c   :  { %v2328_v10 = vpop.eup %2327 }
0x130d   :  { %v1780_v12 = vmul.f32 %v2328_v10, %v1764_v56 }
0x130f   :  { %v1788_v15 = vmul.f32 %v1985_v11, %v1780_v12 }
0x1310   :  { %v2330_v14 = vpop.eup %2329 }
0x1311   :  { %v1796_v16 = vadd.f32 %v1986_v13, %v1788_v15  ;;  %v1781_v17 = vmul.f32 %v2330_v14, %v1765_v61 }
0x1313   :  { %v1798_v18 = vsel %vm65_vm0, %v1796_v16, -inf  ;;  %v1789_v19 = vmul.f32 %v1985_v11, %v1781_v17 }
0x1314   :  { %v1799_v20 = vrot.slane %v1798_v18, 4 }
0x1315   :  { %v1797_v21 = vadd.f32 %v1986_v13, %v1789_v19 }
0x1316   :  { %v1800_v22 = vmax.f32 %v1798_v18, %v1799_v20 }
0x1317   :  { %v1805_v23 = vsel %vm65_vm0, %v1797_v21, -inf }
0x1318   :  { %v1806_v24 = vrot.slane %v1805_v23, 4  ;;  %v1801_v25 = vrot.slane %v1800_v22, 2 }
0x131a   :  { %v1802_v26 = vmax.f32 %v1800_v22, %v1801_v25  ;;  %v1807_v27 = vmax.f32 %v1805_v23, %v1806_v24 }
0x131c   :  { %v1808_v28 = vrot.slane %v1807_v27, 2  ;;  %v1803_v29 = vrot.slane %v1802_v26, 1 }
0x131e   :  { %v1809_v30 = vmax.f32 %v1807_v27, %v1808_v28  ;;  %v1804_v34 = vmax.f32 %v1802_v26, %v1803_v29 }
0x1320   :  { %v1810_v33 = vrot.slane %v1809_v30, 1 }
0x1322   :  { %v1811_v35 = vmax.f32 %v1809_v30, %v1810_v33 }
0x1324   :  { %v1813_v36 = vsel %vm1812_vm6, %v1804_v34, %v1811_v35 }
0x1325   :  { %v1818_v37 = vpack.c.bf16 %v1813_v36, %v1813_v36 }
0x1327   :  { %2227 = vmatmul.mubr.msk.bf16.vlgmr.msra.gmra.mxu1 %vm65_vm0, %v1818_v37 }
0x13e7   :  { %v1875_v40 = vpop.f32.mrf.mxu1 }
0x13e8   :  { %v1876_v41 = vadd.f32 %v1987_v39, %v1875_v40 }
0x13e9   :  { %v2228_v43 = vpop.f32.mrf.mxu1 }
0x13ea   :  { %1882 = vst.msk [vmem:[#allocation2] sm:$0x3] %vm1881_vm7, %v1876_v41 }
0x13eb   :  { %v1878_v44 = vpop.f32.mrf.mxu1 }
0x13ec   :  { %2342 = shalt.err (!%p2339_p4)
}
0x13ed   :  { %1892 = dma.vmem_to_hbm [thread:$0]  %s1890_s24, 32, %s2855_s18, [#allocation3]   ;;  %v2229_v31 = vpop.f32.mrf.mxu1 }
0x13ee   :  { %2351 = dma.done.wait [#allocation3], 32  }
0x13ef   :  { %2352 = vsyncadd [#allocation3], 4294967264 }
0x13f0   :  { %1896 = vsyncpa [#allocation3], 1 }

</bundles_post_ra>
